<compile_context>
chip_gen: v7x
topology: tpu7x:2x2x1
jax: 0.10.0
libtpu: 0.0.40
codegen_flags: <defaults>
</compile_context>

<pallas_src>
import functools

import jax
import jax.numpy as jnp
from jax.experimental import pallas as pl
from jax.experimental.pallas import tpu as pltpu


GATE_PERM = (0, 1, 3, 2)   # padded slot k holds original gate GATE_PERM[k]
                           # -> slot order [i, f, o, g]: 3 sigmoid slots contiguous


def _round_up(x, m):
    return (x + m - 1) // m * m


def _lstm_recurrent_kernel(g_ref, wh_ref, out_ref, hN_ref, cN_ref,
                           h_sc, c_sc, *, t_blk, h_pad, seq_total,
                           needs_mask, unroll):
    """One grid step == t_blk timesteps; h/c carried across blocks in VMEM.

    g_ref  : (t_blk, B_pad, 4*H_pad) bf16  precomputed input gates (pre_cal),
             gate column slots permuted to [i, f, o, g]
    wh_ref : (H_pad, 4*H_pad)        bf16  resident hidden->gates weights
    out_ref: (t_blk, B_pad, H_pad)         per-step hidden outputs (hy)
    hN_ref : (B_pad, H_pad)                final hidden (written on last block)
    cN_ref : (B_pad, H_pad)                final cell   (written on last block)
    """
    blk = pl.program_id(0)

    @pl.when(blk == 0)
    def _init():
        h_sc[...] = jnp.zeros_like(h_sc)
        c_sc[...] = jnp.zeros_like(c_sc)

    # sigmoid(x) == 0.5*tanh(0.5*x) + 0.5, so pre-scale the three sigmoid slots
    # by 0.5 and run ONE tanh over the whole (B, 4*H_pad) slab: a single EUP
    # issue per timestep instead of 3 sigmoids + 1 tanh.  (Hoisted out of the
    # time loop — broadcasts are not CSE'd.)
    col = jax.lax.broadcasted_iota(jnp.int32, (1, 4 * h_pad), 1)
    pre_scale = jnp.where(col < 3 * h_pad, 0.5, 1.0).astype(jnp.float32)

    def step(t, carry):
        h, c = carry
        # hid2hid: bf16 MXU matmul with f32 accumulation.  W_h is indexed at
        # the dot (NOT hoisted into a value) so its vreg live range stays
        # inside the matmul.
        gates = g_ref[t].astype(jnp.float32) + jnp.dot(
            h.astype(jnp.bfloat16), wh_ref[...],
            preferred_element_type=jnp.float32)

        th = jnp.tanh(gates * pre_scale)                 # single EUP slab
        in_gate     = 0.5 * th[:, 0 * h_pad:1 * h_pad] + 0.5
        forget_gate = 0.5 * th[:, 1 * h_pad:2 * h_pad] + 0.5
        out_gate    = 0.5 * th[:, 2 * h_pad:3 * h_pad] + 0.5
        cell_gate   = th[:, 3 * h_pad:4 * h_pad]

        c_new = forget_gate * c + in_gate * cell_gate
        h_new = out_gate * jnp.tanh(c_new)

        if needs_mask:
            # seq was padded up to n_blocks*t_blk: tail steps are no-ops so the
            # final h/c equal the state after step seq_total-1.
            valid = (blk * t_blk + t) < seq_total
            h_new = jnp.where(valid, h_new, h)
            c_new = jnp.where(valid, c_new, c)

        out_ref[pl.ds(t, 1)] = h_new[None].astype(out_ref.dtype)
        return h_new, c_new

    # Partially-unrolled serial time loop: bounds vreg live ranges while keeping
    # scheduler visibility (the previous fully-unrolled Python loop did not).
    h, c = jax.lax.fori_loop(0, t_blk, step, (h_sc[...], c_sc[...]),
                             unroll=unroll)
    h_sc[...] = h
    c_sc[...] = c

    @pl.when(blk == pl.num_programs(0) - 1)
    def _final():
        hN_ref[...] = h.astype(hN_ref.dtype)
        cN_ref[...] = c.astype(cN_ref.dtype)


def lstm_forward(x, w_in, w_h, *, max_t_blk=32):
    """x: (seq, batch, input_size); w_in: (in, 4H); w_h: (H, 4H).

    Returns (outputs, (h_n, c_n)) like the reference module (pre_cal path).
    """
    seq, batch, in_size = x.shape
    hidden = w_h.shape[0]
    assert w_in.shape == (in_size, 4 * hidden)
    assert w_h.shape == (hidden, 4 * hidden)

    h_pad = _round_up(hidden, 128)   # one lane-aligned slot per gate
    b_pad = _round_up(batch, 8)      # sublane-aligned batch
    # TODO(synk): for batch >> 8, block batch toward the MXU row height
    #             (128/256) to fill M of the recurrent matmul.

    # Time blocking without the divisor cliff: pick n_blocks = ceil(seq/max),
    # t_blk = ceil(seq/n_blocks), pad seq to n_blocks*t_blk (waste < n_blocks
    # steps), mask the tail inside the kernel.
    n_blocks = -(-seq // max_t_blk)
    t_blk = -(-seq // n_blocks)
    seq_pad = n_blocks * t_blk
    needs_mask = seq_pad != seq

    # --- pad weights; gate column slots reordered to [i, f, o, g] so the three
    # sigmoid gates are a contiguous slab in the kernel. -----------------------
    def pad_gate_cols(w):
        rows = w.shape[0]
        wp = jnp.zeros((rows, 4 * h_pad), w.dtype)
        for k, src in enumerate(GATE_PERM):
            wp = wp.at[:, k * h_pad:k * h_pad + hidden].set(
                w[:, src * hidden:(src + 1) * hidden])
        return wp

    w_in_p = pad_gate_cols(w_in)                                   # (in, 4*H_pad)
    w_h_p = jnp.zeros((h_pad, 4 * h_pad), jnp.float32)
    w_h_p = w_h_p.at[:hidden, :].set(pad_gate_cols(w_h))           # (H_pad, 4*H_pad)
    w_h_p = w_h_p.astype(jnp.bfloat16)                             # resident bf16

    x_p = jnp.zeros((seq_pad, b_pad, in_size), x.dtype).at[:seq, :batch, :].set(x)

    # Hoisted "pre_cal" input projection: one large GEMM over all timesteps
    # (bf16 operands, f32 accumulation), stored bf16 to halve the dominant HBM
    # stream the recurrent kernel reads.
    gates_in = jnp.einsum(
        'tbi,ih->tbh',
        x_p.astype(jnp.bfloat16), w_in_p.astype(jnp.bfloat16),
        preferred_element_type=jnp.float32).astype(jnp.bfloat16)
    # (seq_pad, B_pad, 4*H_pad) bf16

    # Padding invariant: padded batch rows / padded hidden columns have zero
    # gates_in and zero W_h columns, so their gates are 0 -> i=f=o=0.5, g=0 ->
    # h and c stay exactly 0 forever.  Do NOT add biases into the padded
    # columns without revisiting this.

    kernel = functools.partial(
        _lstm_recurrent_kernel, t_blk=t_blk, h_pad=h_pad, seq_total=seq,
        needs_mask=needs_mask, unroll=min(8, t_blk))

    grid_spec = pltpu.PrefetchScalarGridSpec(
        num_scalar_prefetch=0,
        grid=(n_blocks,),
        in_specs=[
            pl.BlockSpec((t_blk, b_pad, 4 * h_pad), lambda b: (b, 0, 0)),  # gates_in (bf16)
            pl.BlockSpec((h_pad, 4 * h_pad), lambda b: (0, 0)),            # W_h (resident bf16)
        ],
        out_specs=[
            pl.BlockSpec((t_blk, b_pad, h_pad), lambda b: (b, 0, 0)),      # per-step hy
            pl.BlockSpec((b_pad, h_pad), lambda b: (0, 0)),                # final h
            pl.BlockSpec((b_pad, h_pad), lambda b: (0, 0)),                # final c
        ],
        scratch_shapes=[
            pltpu.VMEM((b_pad, h_pad), jnp.float32),   # h carry
            pltpu.VMEM((b_pad, h_pad), jnp.float32),   # c carry
        ],
    )

    outs_p, hN_p, cN_p = pl.pallas_call(
        kernel,
        out_shape=(
            jax.ShapeDtypeStruct((seq_pad, b_pad, h_pad), x.dtype),
            jax.ShapeDtypeStruct((b_pad, h_pad), x.dtype),
            jax.ShapeDtypeStruct((b_pad, h_pad), x.dtype),
        ),
        grid_spec=grid_spec,
        compiler_params=pltpu.CompilerParams(
            dimension_semantics=("arbitrary",),        # serial recurrence over time
            vmem_limit_bytes=32 * 1024 * 1024,         # safe on v5e/v6e/v7x at these sizes
        ),
    )(gates_in, w_h_p)

    # Strip padding; stack per-layer final states -> (num_layers=1, batch, hidden)
    outs = outs_p[:seq, :batch, :hidden]
    h_n = hN_p[:batch, :hidden]
    c_n = cN_p[:batch, :hidden]
    return outs, (h_n[None], c_n[None])


def _lstm_reference(x, w_in, w_h):
    """Pure-JAX reference replicating the PyTorch pre_cal forward.

    Uses the same precision path as the kernel (bf16 gates_in storage, bf16
    matmul operands, f32 accumulation, f32 gate math) so a tight tolerance
    can be used in the check.
    """
    H = w_h.shape[0]
    bf = jnp.bfloat16
    in2hid = jnp.einsum('tbi,ih->tbh', x.astype(bf), w_in.astype(bf),
                        preferred_element_type=jnp.float32).astype(bf)
    w_h_bf = w_h.astype(bf)

    def step(carry, g_in):
        h, c = carry
        gates = g_in.astype(jnp.float32) + jnp.dot(
            h.astype(bf), w_h_bf, preferred_element_type=jnp.float32)
        i = jax.nn.sigmoid(gates[:, 0 * H:1 * H])
        f = jax.nn.sigmoid(gates[:, 1 * H:2 * H])
        g = jnp.tanh(gates[:, 2 * H:3 * H])
        o = jax.nn.sigmoid(gates[:, 3 * H:4 * H])
        c = f * c + i * g
        h = o * jnp.tanh(c)
        return (h, c), h

    h0 = jnp.zeros((x.shape[1], H), jnp.float32)
    (hN, cN), ys = jax.lax.scan(step, (h0, h0), in2hid)
    return ys.astype(x.dtype), (hN[None].astype(x.dtype), cN[None].astype(x.dtype))


if __name__ == "__main__":
    seq, batch, input_size, hidden = 8, 2, 16, 32

    key = jax.random.PRNGKey(0)
    kx, kwi, kwh = jax.random.split(key, 3)

    x = jax.random.normal(kx, (seq, batch, input_size), dtype=jnp.float32)
    # Reference reset_params: U(-sqrt(1/H), sqrt(1/H)) for both weight matrices.
    bnd = 1.0 / (hidden ** 0.5)
    w_in = jax.random.uniform(kwi, (input_size, 4 * hidden),
                              minval=-bnd, maxval=bnd, dtype=jnp.float32)
    w_h = jax.random.uniform(kwh, (hidden, 4 * hidden),
                             minval=-bnd, maxval=bnd, dtype=jnp.float32)

    out, (h_n, c_n) = lstm_forward(x, w_in, w_h)
    jax.block_until_ready((out, h_n, c_n))

    ref_out, (ref_h, ref_c) = _lstm_reference(x, w_in, w_h)
    assert out.shape == (seq, batch, hidden)
    assert h_n.shape == (1, batch, hidden) and c_n.shape == (1, batch, hidden)
    assert jnp.allclose(out, ref_out, atol=5e-3), "output mismatch"
    assert jnp.allclose(h_n, ref_h, atol=5e-3), "h_n mismatch"
    assert jnp.allclose(c_n, ref_c, atol=5e-3), "c_n mismatch"

    print("KERNEL_OK")
</pallas_src>

<mosaic_0001>
module attributes {stable_mosaic.version = 11 : i64} {
  func.func @_lstm_recurrent_kernel(%arg0: i32, %arg1: memref<8x8x512xbf16, #tpu.memory_space<vmem>>, %arg2: memref<128x512xbf16, #tpu.memory_space<vmem>>, %arg3: memref<8x8x128xf32, #tpu.memory_space<vmem>>, %arg4: memref<8x128xf32, #tpu.memory_space<vmem>>, %arg5: memref<8x128xf32, #tpu.memory_space<vmem>>, %arg6: memref<8x128xf32, #tpu.memory_space<vmem>>, %arg7: memref<8x128xf32, #tpu.memory_space<vmem>>) attributes {dimension_semantics = [#tpu.dimension_semantics<arbitrary>], iteration_bounds = array<i64: 1>, scalar_prefetch = 0 : i64, scratch_operands = 2 : i64, tpu.core_type = #tpu.core_type<tc>, window_params = [{transform_indices = @transform_0, window_bounds = array<i64: 8, 8, 512>}, {pipeline_mode = #tpu.pipeline_mode<synchronous>, transform_indices = @transform_1, window_bounds = array<i64: 128, 512>}, {transform_indices = @transform_2, window_bounds = array<i64: 8, 8, 128>}, {pipeline_mode = #tpu.pipeline_mode<synchronous>, transform_indices = @transform_3, window_bounds = array<i64: 8, 128>}, {pipeline_mode = #tpu.pipeline_mode<synchronous>, transform_indices = @transform_4, window_bounds = array<i64: 8, 128>}]} {
    %c0_i32 = arith.constant 0 : i32
    %0 = arith.cmpi eq, %arg0, %c0_i32 : i32
    %1 = arith.extui %0 : i1 to i32
    %c0_i32_0 = arith.constant 0 : i32
    %2 = arith.cmpi ne, %1, %c0_i32_0 : i32
    scf.if %2 {
      %cst_116 = arith.constant 0.000000e+00 : f32
      %296 = vector.broadcast %cst_116 : f32 to vector<8x128xf32>
      %c0_117 = arith.constant 0 : index
      %c0_118 = arith.constant 0 : index
      %297 = vector.load %arg6[%c0_117, %c0_118] : memref<8x128xf32, #tpu.memory_space<vmem>>, vector<8x128xf32>
      tpu.vector_store %arg6[%c0_117, %c0_118], %296 {strides = array<i32>} : memref<8x128xf32, #tpu.memory_space<vmem>>, vector<8x128xf32>,
      %cst_119 = arith.constant 0.000000e+00 : f32
      %298 = vector.broadcast %cst_119 : f32 to vector<8x128xf32>
      %c0_120 = arith.constant 0 : index
      %c0_121 = arith.constant 0 : index
      %299 = vector.load %arg7[%c0_120, %c0_121] : memref<8x128xf32, #tpu.memory_space<vmem>>, vector<8x128xf32>
      tpu.vector_store %arg7[%c0_120, %c0_121], %298 {strides = array<i32>} : memref<8x128xf32, #tpu.memory_space<vmem>>, vector<8x128xf32>,
    } else {
    }
    %3 = tpu.iota {dimensions = array<i32: 1>} : vector<1x512xi32>
    %c384_i32 = arith.constant 384 : i32
    %4 = vector.broadcast %c384_i32 : i32 to vector<1x512xi32>
    %5 = arith.cmpi slt, %3, %4 : vector<1x512xi32>
    %cst = arith.constant 5.000000e-01 : f32
    %cst_1 = arith.constant 1.000000e+00 : f32
    %6 = vector.broadcast %cst : f32 to vector<1x512xf32>
    %7 = vector.broadcast %cst_1 : f32 to vector<1x512xf32>
    %8 = arith.select %5, %6, %7 : vector<1x512xi1>, vector<1x512xf32>
    %c0 = arith.constant 0 : index
    %c0_2 = arith.constant 0 : index
    %9 = vector.load %arg6[%c0, %c0_2] : memref<8x128xf32, #tpu.memory_space<vmem>>, vector<8x128xf32>
    %c0_3 = arith.constant 0 : index
    %c0_4 = arith.constant 0 : index
    %10 = vector.load %arg7[%c0_3, %c0_4] : memref<8x128xf32, #tpu.memory_space<vmem>>, vector<8x128xf32>
    %c0_i32_5 = arith.constant 0 : i32
    %11 = arith.index_cast %c0_i32_5 : i32 to index
    %c0_6 = arith.constant 0 : index
    %c0_7 = arith.constant 0 : index
    %12 = vector.load %arg1[%11, %c0_6, %c0_7] : memref<8x8x512xbf16, #tpu.memory_space<vmem>>, vector<1x8x512xbf16>
    %13 = vector.shape_cast %12 : vector<1x8x512xbf16> to vector<8x512xbf16>
    %14 = arith.extf %13 : vector<8x512xbf16> to vector<8x512xf32>
    %15 = arith.truncf %9 : vector<8x128xf32> to vector<8x128xbf16>
    %c0_8 = arith.constant 0 : index
    %c0_9 = arith.constant 0 : index
    %16 = vector.load %arg2[%c0_8, %c0_9] : memref<128x512xbf16, #tpu.memory_space<vmem>>, vector<128x512xbf16>
    %cst_10 = arith.constant dense<0.000000e+00> : vector<8x512xf32>
    %17 = tpu.matmul %15, %16, %cst_10 {dimension_numbers = #tpu.dot_dimension_numbers<[1], [0], [0], [1], [0, 0, 1, 1], [], []>} : vector<8x128xbf16>, vector<128x512xbf16>, vector<8x512xf32> -> vector<8x512xf32>
    %18 = arith.addf %14, %17 : vector<8x512xf32>
    %19 = vector.broadcast %8 : vector<1x512xf32> to vector<8x512xf32>
    %20 = arith.mulf %18, %19 : vector<8x512xf32>
    %21 = math.tanh %20 : vector<8x512xf32>
    %22 = vector.extract_strided_slice %21 {offsets = [0, 0], sizes = [8, 128], strides = [1, 1]} : vector<8x512xf32> to vector<8x128xf32>
    %cst_11 = arith.constant 5.000000e-01 : f32
    %23 = vector.broadcast %cst_11 : f32 to vector<8x128xf32>
    %24 = arith.mulf %23, %22 : vector<8x128xf32>
    %cst_12 = arith.constant 5.000000e-01 : f32
    %25 = vector.broadcast %cst_12 : f32 to vector<8x128xf32>
    %26 = arith.addf %24, %25 : vector<8x128xf32>
    %27 = vector.extract_strided_slice %21 {offsets = [0, 128], sizes = [8, 128], strides = [1, 1]} : vector<8x512xf32> to vector<8x128xf32>
    %cst_13 = arith.constant 5.000000e-01 : f32
    %28 = vector.broadcast %cst_13 : f32 to vector<8x128xf32>
    %29 = arith.mulf %28, %27 : vector<8x128xf32>
    %cst_14 = arith.constant 5.000000e-01 : f32
    %30 = vector.broadcast %cst_14 : f32 to vector<8x128xf32>
    %31 = arith.addf %29, %30 : vector<8x128xf32>
    %32 = vector.extract_strided_slice %21 {offsets = [0, 256], sizes = [8, 128], strides = [1, 1]} : vector<8x512xf32> to vector<8x128xf32>
    %cst_15 = arith.constant 5.000000e-01 : f32
    %33 = vector.broadcast %cst_15 : f32 to vector<8x128xf32>
    %34 = arith.mulf %33, %32 : vector<8x128xf32>
    %cst_16 = arith.constant 5.000000e-01 : f32
    %35 = vector.broadcast %cst_16 : f32 to vector<8x128xf32>
    %36 = arith.addf %34, %35 : vector<8x128xf32>
    %37 = vector.extract_strided_slice %21 {offsets = [0, 384], sizes = [8, 128], strides = [1, 1]} : vector<8x512xf32> to vector<8x128xf32>
    %38 = arith.mulf %31, %10 : vector<8x128xf32>
    %39 = arith.mulf %26, %37 : vector<8x128xf32>
    %40 = arith.addf %38, %39 : vector<8x128xf32>
    %41 = math.tanh %40 : vector<8x128xf32>
    %42 = arith.mulf %36, %41 : vector<8x128xf32>
    %43 = vector.shape_cast %42 : vector<8x128xf32> to vector<1x8x128xf32>
    %44 = arith.index_cast %c0_i32_5 : i32 to index
    %c0_17 = arith.constant 0 : index
    %c0_18 = arith.constant 0 : index
    %45 = vector.load %arg3[%44, %c0_17, %c0_18] : memref<8x8x128xf32, #tpu.memory_space<vmem>>, vector<1x8x128xf32>
    tpu.vector_store %arg3[%44, %c0_17, %c0_18], %43 {strides = array<i32>} : memref<8x8x128xf32, #tpu.memory_space<vmem>>, vector<1x8x128xf32>,
    %c1_i32 = arith.constant 1 : i32
    %46 = arith.index_cast %c1_i32 : i32 to index
    %c0_19 = arith.constant 0 : index
    %c0_20 = arith.constant 0 : index
    %47 = vector.load %arg1[%46, %c0_19, %c0_20] : memref<8x8x512xbf16, #tpu.memory_space<vmem>>, vector<1x8x512xbf16>
    %48 = vector.shape_cast %47 : vector<1x8x512xbf16> to vector<8x512xbf16>
    %49 = arith.extf %48 : vector<8x512xbf16> to vector<8x512xf32>
    %50 = arith.truncf %42 : vector<8x128xf32> to vector<8x128xbf16>
    %c0_21 = arith.constant 0 : index
    %c0_22 = arith.constant 0 : index
    %51 = vector.load %arg2[%c0_21, %c0_22] : memref<128x512xbf16, #tpu.memory_space<vmem>>, vector<128x512xbf16>
    %cst_23 = arith.constant dense<0.000000e+00> : vector<8x512xf32>
    %52 = tpu.matmul %50, %51, %cst_23 {dimension_numbers = #tpu.dot_dimension_numbers<[1], [0], [0], [1], [0, 0, 1, 1], [], []>} : vector<8x128xbf16>, vector<128x512xbf16>, vector<8x512xf32> -> vector<8x512xf32>
    %53 = arith.addf %49, %52 : vector<8x512xf32>
    %54 = vector.broadcast %8 : vector<1x512xf32> to vector<8x512xf32>
    %55 = arith.mulf %53, %54 : vector<8x512xf32>
    %56 = math.tanh %55 : vector<8x512xf32>
    %57 = vector.extract_strided_slice %56 {offsets = [0, 0], sizes = [8, 128], strides = [1, 1]} : vector<8x512xf32> to vector<8x128xf32>
    %cst_24 = arith.constant 5.000000e-01 : f32
    %58 = vector.broadcast %cst_24 : f32 to vector<8x128xf32>
    %59 = arith.mulf %58, %57 : vector<8x128xf32>
    %cst_25 = arith.constant 5.000000e-01 : f32
    %60 = vector.broadcast %cst_25 : f32 to vector<8x128xf32>
    %61 = arith.addf %59, %60 : vector<8x128xf32>
    %62 = vector.extract_strided_slice %56 {offsets = [0, 128], sizes = [8, 128], strides = [1, 1]} : vector<8x512xf32> to vector<8x128xf32>
    %cst_26 = arith.constant 5.000000e-01 : f32
    %63 = vector.broadcast %cst_26 : f32 to vector<8x128xf32>
    %64 = arith.mulf %63, %62 : vector<8x128xf32>
    %cst_27 = arith.constant 5.000000e-01 : f32
    %65 = vector.broadcast %cst_27 : f32 to vector<8x128xf32>
    %66 = arith.addf %64, %65 : vector<8x128xf32>
    %67 = vector.extract_strided_slice %56 {offsets = [0, 256], sizes = [8, 128], strides = [1, 1]} : vector<8x512xf32> to vector<8x128xf32>
    %cst_28 = arith.constant 5.000000e-01 : f32
    %68 = vector.broadcast %cst_28 : f32 to vector<8x128xf32>
    %69 = arith.mulf %68, %67 : vector<8x128xf32>
    %cst_29 = arith.constant 5.000000e-01 : f32
    %70 = vector.broadcast %cst_29 : f32 to vector<8x128xf32>
    %71 = arith.addf %69, %70 : vector<8x128xf32>
    %72 = vector.extract_strided_slice %56 {offsets = [0, 384], sizes = [8, 128], strides = [1, 1]} : vector<8x512xf32> to vector<8x128xf32>
    %73 = arith.mulf %66, %40 : vector<8x128xf32>
    %74 = arith.mulf %61, %72 : vector<8x128xf32>
    %75 = arith.addf %73, %74 : vector<8x128xf32>
    %76 = math.tanh %75 : vector<8x128xf32>
    %77 = arith.mulf %71, %76 : vector<8x128xf32>
    %78 = vector.shape_cast %77 : vector<8x128xf32> to vector<1x8x128xf32>
    %79 = arith.index_cast %c1_i32 : i32 to index
    %c0_30 = arith.constant 0 : index
    %c0_31 = arith.constant 0 : index
    %80 = vector.load %arg3[%79, %c0_30, %c0_31] : memref<8x8x128xf32, #tpu.memory_space<vmem>>, vector<1x8x128xf32>
    tpu.vector_store %arg3[%79, %c0_30, %c0_31], %78 {strides = array<i32>} : memref<8x8x128xf32, #tpu.memory_space<vmem>>, vector<1x8x128xf32>,
    %c2_i32 = arith.constant 2 : i32
    %81 = arith.index_cast %c2_i32 : i32 to index
    %c0_32 = arith.constant 0 : index
    %c0_33 = arith.constant 0 : index
    %82 = vector.load %arg1[%81, %c0_32, %c0_33] : memref<8x8x512xbf16, #tpu.memory_space<vmem>>, vector<1x8x512xbf16>
    %83 = vector.shape_cast %82 : vector<1x8x512xbf16> to vector<8x512xbf16>
    %84 = arith.extf %83 : vector<8x512xbf16> to vector<8x512xf32>
    %85 = arith.truncf %77 : vector<8x128xf32> to vector<8x128xbf16>
    %c0_34 = arith.constant 0 : index
    %c0_35 = arith.constant 0 : index
    %86 = vector.load %arg2[%c0_34, %c0_35] : memref<128x512xbf16, #tpu.memory_space<vmem>>, vector<128x512xbf16>
    %cst_36 = arith.constant dense<0.000000e+00> : vector<8x512xf32>
    %87 = tpu.matmul %85, %86, %cst_36 {dimension_numbers = #tpu.dot_dimension_numbers<[1], [0], [0], [1], [0, 0, 1, 1], [], []>} : vector<8x128xbf16>, vector<128x512xbf16>, vector<8x512xf32> -> vector<8x512xf32>
    %88 = arith.addf %84, %87 : vector<8x512xf32>
    %89 = vector.broadcast %8 : vector<1x512xf32> to vector<8x512xf32>
    %90 = arith.mulf %88, %89 : vector<8x512xf32>
    %91 = math.tanh %90 : vector<8x512xf32>
    %92 = vector.extract_strided_slice %91 {offsets = [0, 0], sizes = [8, 128], strides = [1, 1]} : vector<8x512xf32> to vector<8x128xf32>
    %cst_37 = arith.constant 5.000000e-01 : f32
    %93 = vector.broadcast %cst_37 : f32 to vector<8x128xf32>
    %94 = arith.mulf %93, %92 : vector<8x128xf32>
    %cst_38 = arith.constant 5.000000e-01 : f32
    %95 = vector.broadcast %cst_38 : f32 to vector<8x128xf32>
    %96 = arith.addf %94, %95 : vector<8x128xf32>
    %97 = vector.extract_strided_slice %91 {offsets = [0, 128], sizes = [8, 128], strides = [1, 1]} : vector<8x512xf32> to vector<8x128xf32>
    %cst_39 = arith.constant 5.000000e-01 : f32
    %98 = vector.broadcast %cst_39 : f32 to vector<8x128xf32>
    %99 = arith.mulf %98, %97 : vector<8x128xf32>
    %cst_40 = arith.constant 5.000000e-01 : f32
    %100 = vector.broadcast %cst_40 : f32 to vector<8x128xf32>
    %101 = arith.addf %99, %100 : vector<8x128xf32>
    %102 = vector.extract_strided_slice %91 {offsets = [0, 256], sizes = [8, 128], strides = [1, 1]} : vector<8x512xf32> to vector<8x128xf32>
    %cst_41 = arith.constant 5.000000e-01 : f32
    %103 = vector.broadcast %cst_41 : f32 to vector<8x128xf32>
    %104 = arith.mulf %103, %102 : vector<8x128xf32>
    %cst_42 = arith.constant 5.000000e-01 : f32
    %105 = vector.broadcast %cst_42 : f32 to vector<8x128xf32>
    %106 = arith.addf %104, %105 : vector<8x128xf32>
    %107 = vector.extract_strided_slice %91 {offsets = [0, 384], sizes = [8, 128], strides = [1, 1]} : vector<8x512xf32> to vector<8x128xf32>
    %108 = arith.mulf %101, %75 : vector<8x128xf32>
    %109 = arith.mulf %96, %107 : vector<8x128xf32>
    %110 = arith.addf %108, %109 : vector<8x128xf32>
    %111 = math.tanh %110 : vector<8x128xf32>
    %112 = arith.mulf %106, %111 : vector<8x128xf32>
    %113 = vector.shape_cast %112 : vector<8x128xf32> to vector<1x8x128xf32>
    %114 = arith.index_cast %c2_i32 : i32 to index
    %c0_43 = arith.constant 0 : index
    %c0_44 = arith.constant 0 : index
    %115 = vector.load %arg3[%114, %c0_43, %c0_44] : memref<8x8x128xf32, #tpu.memory_space<vmem>>, vector<1x8x128xf32>
    tpu.vector_store %arg3[%114, %c0_43, %c0_44], %113 {strides = array<i32>} : memref<8x8x128xf32, #tpu.memory_space<vmem>>, vector<1x8x128xf32>,
    %c3_i32 = arith.constant 3 : i32
    %116 = arith.index_cast %c3_i32 : i32 to index
    %c0_45 = arith.constant 0 : index
    %c0_46 = arith.constant 0 : index
    %117 = vector.load %arg1[%116, %c0_45, %c0_46] : memref<8x8x512xbf16, #tpu.memory_space<vmem>>, vector<1x8x512xbf16>
    %118 = vector.shape_cast %117 : vector<1x8x512xbf16> to vector<8x512xbf16>
    %119 = arith.extf %118 : vector<8x512xbf16> to vector<8x512xf32>
    %120 = arith.truncf %112 : vector<8x128xf32> to vector<8x128xbf16>
    %c0_47 = arith.constant 0 : index
    %c0_48 = arith.constant 0 : index
    %121 = vector.load %arg2[%c0_47, %c0_48] : memref<128x512xbf16, #tpu.memory_space<vmem>>, vector<128x512xbf16>
    %cst_49 = arith.constant dense<0.000000e+00> : vector<8x512xf32>
    %122 = tpu.matmul %120, %121, %cst_49 {dimension_numbers = #tpu.dot_dimension_numbers<[1], [0], [0], [1], [0, 0, 1, 1], [], []>} : vector<8x128xbf16>, vector<128x512xbf16>, vector<8x512xf32> -> vector<8x512xf32>
    %123 = arith.addf %119, %122 : vector<8x512xf32>
    %124 = vector.broadcast %8 : vector<1x512xf32> to vector<8x512xf32>
    %125 = arith.mulf %123, %124 : vector<8x512xf32>
    %126 = math.tanh %125 : vector<8x512xf32>
    %127 = vector.extract_strided_slice %126 {offsets = [0, 0], sizes = [8, 128], strides = [1, 1]} : vector<8x512xf32> to vector<8x128xf32>
    %cst_50 = arith.constant 5.000000e-01 : f32
    %128 = vector.broadcast %cst_50 : f32 to vector<8x128xf32>
    %129 = arith.mulf %128, %127 : vector<8x128xf32>
    %cst_51 = arith.constant 5.000000e-01 : f32
    %130 = vector.broadcast %cst_51 : f32 to vector<8x128xf32>
    %131 = arith.addf %129, %130 : vector<8x128xf32>
    %132 = vector.extract_strided_slice %126 {offsets = [0, 128], sizes = [8, 128], strides = [1, 1]} : vector<8x512xf32> to vector<8x128xf32>
    %cst_52 = arith.constant 5.000000e-01 : f32
    %133 = vector.broadcast %cst_52 : f32 to vector<8x128xf32>
    %134 = arith.mulf %133, %132 : vector<8x128xf32>
    %cst_53 = arith.constant 5.000000e-01 : f32
    %135 = vector.broadcast %cst_53 : f32 to vector<8x128xf32>
    %136 = arith.addf %134, %135 : vector<8x128xf32>
    %137 = vector.extract_strided_slice %126 {offsets = [0, 256], sizes = [8, 128], strides = [1, 1]} : vector<8x512xf32> to vector<8x128xf32>
    %cst_54 = arith.constant 5.000000e-01 : f32
    %138 = vector.broadcast %cst_54 : f32 to vector<8x128xf32>
    %139 = arith.mulf %138, %137 : vector<8x128xf32>
    %cst_55 = arith.constant 5.000000e-01 : f32
    %140 = vector.broadcast %cst_55 : f32 to vector<8x128xf32>
    %141 = arith.addf %139, %140 : vector<8x128xf32>
    %142 = vector.extract_strided_slice %126 {offsets = [0, 384], sizes = [8, 128], strides = [1, 1]} : vector<8x512xf32> to vector<8x128xf32>
    %143 = arith.mulf %136, %110 : vector<8x128xf32>
    %144 = arith.mulf %131, %142 : vector<8x128xf32>
    %145 = arith.addf %143, %144 : vector<8x128xf32>
    %146 = math.tanh %145 : vector<8x128xf32>
    %147 = arith.mulf %141, %146 : vector<8x128xf32>
    %148 = vector.shape_cast %147 : vector<8x128xf32> to vector<1x8x128xf32>
    %149 = arith.index_cast %c3_i32 : i32 to index
    %c0_56 = arith.constant 0 : index
    %c0_57 = arith.constant 0 : index
    %150 = vector.load %arg3[%149, %c0_56, %c0_57] : memref<8x8x128xf32, #tpu.memory_space<vmem>>, vector<1x8x128xf32>
    tpu.vector_store %arg3[%149, %c0_56, %c0_57], %148 {strides = array<i32>} : memref<8x8x128xf32, #tpu.memory_space<vmem>>, vector<1x8x128xf32>,
    %c4_i32 = arith.constant 4 : i32
    %151 = arith.index_cast %c4_i32 : i32 to index
    %c0_58 = arith.constant 0 : index
    %c0_59 = arith.constant 0 : index
    %152 = vector.load %arg1[%151, %c0_58, %c0_59] : memref<8x8x512xbf16, #tpu.memory_space<vmem>>, vector<1x8x512xbf16>
    %153 = vector.shape_cast %152 : vector<1x8x512xbf16> to vector<8x512xbf16>
    %154 = arith.extf %153 : vector<8x512xbf16> to vector<8x512xf32>
    %155 = arith.truncf %147 : vector<8x128xf32> to vector<8x128xbf16>
    %c0_60 = arith.constant 0 : index
    %c0_61 = arith.constant 0 : index
    %156 = vector.load %arg2[%c0_60, %c0_61] : memref<128x512xbf16, #tpu.memory_space<vmem>>, vector<128x512xbf16>
    %cst_62 = arith.constant dense<0.000000e+00> : vector<8x512xf32>
    %157 = tpu.matmul %155, %156, %cst_62 {dimension_numbers = #tpu.dot_dimension_numbers<[1], [0], [0], [1], [0, 0, 1, 1], [], []>} : vector<8x128xbf16>, vector<128x512xbf16>, vector<8x512xf32> -> vector<8x512xf32>
    %158 = arith.addf %154, %157 : vector<8x512xf32>
    %159 = vector.broadcast %8 : vector<1x512xf32> to vector<8x512xf32>
    %160 = arith.mulf %158, %159 : vector<8x512xf32>
    %161 = math.tanh %160 : vector<8x512xf32>
    %162 = vector.extract_strided_slice %161 {offsets = [0, 0], sizes = [8, 128], strides = [1, 1]} : vector<8x512xf32> to vector<8x128xf32>
    %cst_63 = arith.constant 5.000000e-01 : f32
    %163 = vector.broadcast %cst_63 : f32 to vector<8x128xf32>
    %164 = arith.mulf %163, %162 : vector<8x128xf32>
    %cst_64 = arith.constant 5.000000e-01 : f32
    %165 = vector.broadcast %cst_64 : f32 to vector<8x128xf32>
    %166 = arith.addf %164, %165 : vector<8x128xf32>
    %167 = vector.extract_strided_slice %161 {offsets = [0, 128], sizes = [8, 128], strides = [1, 1]} : vector<8x512xf32> to vector<8x128xf32>
    %cst_65 = arith.constant 5.000000e-01 : f32
    %168 = vector.broadcast %cst_65 : f32 to vector<8x128xf32>
    %169 = arith.mulf %168, %167 : vector<8x128xf32>
    %cst_66 = arith.constant 5.000000e-01 : f32
    %170 = vector.broadcast %cst_66 : f32 to vector<8x128xf32>
    %171 = arith.addf %169, %170 : vector<8x128xf32>
    %172 = vector.extract_strided_slice %161 {offsets = [0, 256], sizes = [8, 128], strides = [1, 1]} : vector<8x512xf32> to vector<8x128xf32>
    %cst_67 = arith.constant 5.000000e-01 : f32
    %173 = vector.broadcast %cst_67 : f32 to vector<8x128xf32>
    %174 = arith.mulf %173, %172 : vector<8x128xf32>
    %cst_68 = arith.constant 5.000000e-01 : f32
    %175 = vector.broadcast %cst_68 : f32 to vector<8x128xf32>
    %176 = arith.addf %174, %175 : vector<8x128xf32>
    %177 = vector.extract_strided_slice %161 {offsets = [0, 384], sizes = [8, 128], strides = [1, 1]} : vector<8x512xf32> to vector<8x128xf32>
    %178 = arith.mulf %171, %145 : vector<8x128xf32>
    %179 = arith.mulf %166, %177 : vector<8x128xf32>
    %180 = arith.addf %178, %179 : vector<8x128xf32>
    %181 = math.tanh %180 : vector<8x128xf32>
    %182 = arith.mulf %176, %181 : vector<8x128xf32>
    %183 = vector.shape_cast %182 : vector<8x128xf32> to vector<1x8x128xf32>
    %184 = arith.index_cast %c4_i32 : i32 to index
    %c0_69 = arith.constant 0 : index
    %c0_70 = arith.constant 0 : index
    %185 = vector.load %arg3[%184, %c0_69, %c0_70] : memref<8x8x128xf32, #tpu.memory_space<vmem>>, vector<1x8x128xf32>
    tpu.vector_store %arg3[%184, %c0_69, %c0_70], %183 {strides = array<i32>} : memref<8x8x128xf32, #tpu.memory_space<vmem>>, vector<1x8x128xf32>,
    %c5_i32 = arith.constant 5 : i32
    %186 = arith.index_cast %c5_i32 : i32 to index
    %c0_71 = arith.constant 0 : index
    %c0_72 = arith.constant 0 : index
    %187 = vector.load %arg1[%186, %c0_71, %c0_72] : memref<8x8x512xbf16, #tpu.memory_space<vmem>>, vector<1x8x512xbf16>
    %188 = vector.shape_cast %187 : vector<1x8x512xbf16> to vector<8x512xbf16>
    %189 = arith.extf %188 : vector<8x512xbf16> to vector<8x512xf32>
    %190 = arith.truncf %182 : vector<8x128xf32> to vector<8x128xbf16>
    %c0_73 = arith.constant 0 : index
    %c0_74 = arith.constant 0 : index
    %191 = vector.load %arg2[%c0_73, %c0_74] : memref<128x512xbf16, #tpu.memory_space<vmem>>, vector<128x512xbf16>
    %cst_75 = arith.constant dense<0.000000e+00> : vector<8x512xf32>
    %192 = tpu.matmul %190, %191, %cst_75 {dimension_numbers = #tpu.dot_dimension_numbers<[1], [0], [0], [1], [0, 0, 1, 1], [], []>} : vector<8x128xbf16>, vector<128x512xbf16>, vector<8x512xf32> -> vector<8x512xf32>
    %193 = arith.addf %189, %192 : vector<8x512xf32>
    %194 = vector.broadcast %8 : vector<1x512xf32> to vector<8x512xf32>
    %195 = arith.mulf %193, %194 : vector<8x512xf32>
    %196 = math.tanh %195 : vector<8x512xf32>
    %197 = vector.extract_strided_slice %196 {offsets = [0, 0], sizes = [8, 128], strides = [1, 1]} : vector<8x512xf32> to vector<8x128xf32>
    %cst_76 = arith.constant 5.000000e-01 : f32
    %198 = vector.broadcast %cst_76 : f32 to vector<8x128xf32>
    %199 = arith.mulf %198, %197 : vector<8x128xf32>
    %cst_77 = arith.constant 5.000000e-01 : f32
    %200 = vector.broadcast %cst_77 : f32 to vector<8x128xf32>
    %201 = arith.addf %199, %200 : vector<8x128xf32>
    %202 = vector.extract_strided_slice %196 {offsets = [0, 128], sizes = [8, 128], strides = [1, 1]} : vector<8x512xf32> to vector<8x128xf32>
    %cst_78 = arith.constant 5.000000e-01 : f32
    %203 = vector.broadcast %cst_78 : f32 to vector<8x128xf32>
    %204 = arith.mulf %203, %202 : vector<8x128xf32>
    %cst_79 = arith.constant 5.000000e-01 : f32
    %205 = vector.broadcast %cst_79 : f32 to vector<8x128xf32>
    %206 = arith.addf %204, %205 : vector<8x128xf32>
    %207 = vector.extract_strided_slice %196 {offsets = [0, 256], sizes = [8, 128], strides = [1, 1]} : vector<8x512xf32> to vector<8x128xf32>
    %cst_80 = arith.constant 5.000000e-01 : f32
    %208 = vector.broadcast %cst_80 : f32 to vector<8x128xf32>
    %209 = arith.mulf %208, %207 : vector<8x128xf32>
    %cst_81 = arith.constant 5.000000e-01 : f32
    %210 = vector.broadcast %cst_81 : f32 to vector<8x128xf32>
    %211 = arith.addf %209, %210 : vector<8x128xf32>
    %212 = vector.extract_strided_slice %196 {offsets = [0, 384], sizes = [8, 128], strides = [1, 1]} : vector<8x512xf32> to vector<8x128xf32>
    %213 = arith.mulf %206, %180 : vector<8x128xf32>
    %214 = arith.mulf %201, %212 : vector<8x128xf32>
    %215 = arith.addf %213, %214 : vector<8x128xf32>
    %216 = math.tanh %215 : vector<8x128xf32>
    %217 = arith.mulf %211, %216 : vector<8x128xf32>
    %218 = vector.shape_cast %217 : vector<8x128xf32> to vector<1x8x128xf32>
    %219 = arith.index_cast %c5_i32 : i32 to index
    %c0_82 = arith.constant 0 : index
    %c0_83 = arith.constant 0 : index
    %220 = vector.load %arg3[%219, %c0_82, %c0_83] : memref<8x8x128xf32, #tpu.memory_space<vmem>>, vector<1x8x128xf32>
    tpu.vector_store %arg3[%219, %c0_82, %c0_83], %218 {strides = array<i32>} : memref<8x8x128xf32, #tpu.memory_space<vmem>>, vector<1x8x128xf32>,
    %c6_i32 = arith.constant 6 : i32
    %221 = arith.index_cast %c6_i32 : i32 to index
    %c0_84 = arith.constant 0 : index
    %c0_85 = arith.constant 0 : index
    %222 = vector.load %arg1[%221, %c0_84, %c0_85] : memref<8x8x512xbf16, #tpu.memory_space<vmem>>, vector<1x8x512xbf16>
    %223 = vector.shape_cast %222 : vector<1x8x512xbf16> to vector<8x512xbf16>
    %224 = arith.extf %223 : vector<8x512xbf16> to vector<8x512xf32>
    %225 = arith.truncf %217 : vector<8x128xf32> to vector<8x128xbf16>
    %c0_86 = arith.constant 0 : index
    %c0_87 = arith.constant 0 : index
    %226 = vector.load %arg2[%c0_86, %c0_87] : memref<128x512xbf16, #tpu.memory_space<vmem>>, vector<128x512xbf16>
    %cst_88 = arith.constant dense<0.000000e+00> : vector<8x512xf32>
    %227 = tpu.matmul %225, %226, %cst_88 {dimension_numbers = #tpu.dot_dimension_numbers<[1], [0], [0], [1], [0, 0, 1, 1], [], []>} : vector<8x128xbf16>, vector<128x512xbf16>, vector<8x512xf32> -> vector<8x512xf32>
    %228 = arith.addf %224, %227 : vector<8x512xf32>
    %229 = vector.broadcast %8 : vector<1x512xf32> to vector<8x512xf32>
    %230 = arith.mulf %228, %229 : vector<8x512xf32>
    %231 = math.tanh %230 : vector<8x512xf32>
    %232 = vector.extract_strided_slice %231 {offsets = [0, 0], sizes = [8, 128], strides = [1, 1]} : vector<8x512xf32> to vector<8x128xf32>
    %cst_89 = arith.constant 5.000000e-01 : f32
    %233 = vector.broadcast %cst_89 : f32 to vector<8x128xf32>
    %234 = arith.mulf %233, %232 : vector<8x128xf32>
    %cst_90 = arith.constant 5.000000e-01 : f32
    %235 = vector.broadcast %cst_90 : f32 to vector<8x128xf32>
    %236 = arith.addf %234, %235 : vector<8x128xf32>
    %237 = vector.extract_strided_slice %231 {offsets = [0, 128], sizes = [8, 128], strides = [1, 1]} : vector<8x512xf32> to vector<8x128xf32>
    %cst_91 = arith.constant 5.000000e-01 : f32
    %238 = vector.broadcast %cst_91 : f32 to vector<8x128xf32>
    %239 = arith.mulf %238, %237 : vector<8x128xf32>
    %cst_92 = arith.constant 5.000000e-01 : f32
    %240 = vector.broadcast %cst_92 : f32 to vector<8x128xf32>
    %241 = arith.addf %239, %240 : vector<8x128xf32>
    %242 = vector.extract_strided_slice %231 {offsets = [0, 256], sizes = [8, 128], strides = [1, 1]} : vector<8x512xf32> to vector<8x128xf32>
    %cst_93 = arith.constant 5.000000e-01 : f32
    %243 = vector.broadcast %cst_93 : f32 to vector<8x128xf32>
    %244 = arith.mulf %243, %242 : vector<8x128xf32>
    %cst_94 = arith.constant 5.000000e-01 : f32
    %245 = vector.broadcast %cst_94 : f32 to vector<8x128xf32>
    %246 = arith.addf %244, %245 : vector<8x128xf32>
    %247 = vector.extract_strided_slice %231 {offsets = [0, 384], sizes = [8, 128], strides = [1, 1]} : vector<8x512xf32> to vector<8x128xf32>
    %248 = arith.mulf %241, %215 : vector<8x128xf32>
    %249 = arith.mulf %236, %247 : vector<8x128xf32>
    %250 = arith.addf %248, %249 : vector<8x128xf32>
    %251 = math.tanh %250 : vector<8x128xf32>
    %252 = arith.mulf %246, %251 : vector<8x128xf32>
    %253 = vector.shape_cast %252 : vector<8x128xf32> to vector<1x8x128xf32>
    %254 = arith.index_cast %c6_i32 : i32 to index
    %c0_95 = arith.constant 0 : index
    %c0_96 = arith.constant 0 : index
    %255 = vector.load %arg3[%254, %c0_95, %c0_96] : memref<8x8x128xf32, #tpu.memory_space<vmem>>, vector<1x8x128xf32>
    tpu.vector_store %arg3[%254, %c0_95, %c0_96], %253 {strides = array<i32>} : memref<8x8x128xf32, #tpu.memory_space<vmem>>, vector<1x8x128xf32>,
    %c7_i32 = arith.constant 7 : i32
    %256 = arith.index_cast %c7_i32 : i32 to index
    %c0_97 = arith.constant 0 : index
    %c0_98 = arith.constant 0 : index
    %257 = vector.load %arg1[%256, %c0_97, %c0_98] : memref<8x8x512xbf16, #tpu.memory_space<vmem>>, vector<1x8x512xbf16>
    %258 = vector.shape_cast %257 : vector<1x8x512xbf16> to vector<8x512xbf16>
    %259 = arith.extf %258 : vector<8x512xbf16> to vector<8x512xf32>
    %260 = arith.truncf %252 : vector<8x128xf32> to vector<8x128xbf16>
    %c0_99 = arith.constant 0 : index
    %c0_100 = arith.constant 0 : index
    %261 = vector.load %arg2[%c0_99, %c0_100] : memref<128x512xbf16, #tpu.memory_space<vmem>>, vector<128x512xbf16>
    %cst_101 = arith.constant dense<0.000000e+00> : vector<8x512xf32>
    %262 = tpu.matmul %260, %261, %cst_101 {dimension_numbers = #tpu.dot_dimension_numbers<[1], [0], [0], [1], [0, 0, 1, 1], [], []>} : vector<8x128xbf16>, vector<128x512xbf16>, vector<8x512xf32> -> vector<8x512xf32>
    %263 = arith.addf %259, %262 : vector<8x512xf32>
    %264 = vector.broadcast %8 : vector<1x512xf32> to vector<8x512xf32>
    %265 = arith.mulf %263, %264 : vector<8x512xf32>
    %266 = math.tanh %265 : vector<8x512xf32>
    %267 = vector.extract_strided_slice %266 {offsets = [0, 0], sizes = [8, 128], strides = [1, 1]} : vector<8x512xf32> to vector<8x128xf32>
    %cst_102 = arith.constant 5.000000e-01 : f32
    %268 = vector.broadcast %cst_102 : f32 to vector<8x128xf32>
    %269 = arith.mulf %268, %267 : vector<8x128xf32>
    %cst_103 = arith.constant 5.000000e-01 : f32
    %270 = vector.broadcast %cst_103 : f32 to vector<8x128xf32>
    %271 = arith.addf %269, %270 : vector<8x128xf32>
    %272 = vector.extract_strided_slice %266 {offsets = [0, 128], sizes = [8, 128], strides = [1, 1]} : vector<8x512xf32> to vector<8x128xf32>
    %cst_104 = arith.constant 5.000000e-01 : f32
    %273 = vector.broadcast %cst_104 : f32 to vector<8x128xf32>
    %274 = arith.mulf %273, %272 : vector<8x128xf32>
    %cst_105 = arith.constant 5.000000e-01 : f32
    %275 = vector.broadcast %cst_105 : f32 to vector<8x128xf32>
    %276 = arith.addf %274, %275 : vector<8x128xf32>
    %277 = vector.extract_strided_slice %266 {offsets = [0, 256], sizes = [8, 128], strides = [1, 1]} : vector<8x512xf32> to vector<8x128xf32>
    %cst_106 = arith.constant 5.000000e-01 : f32
    %278 = vector.broadcast %cst_106 : f32 to vector<8x128xf32>
    %279 = arith.mulf %278, %277 : vector<8x128xf32>
    %cst_107 = arith.constant 5.000000e-01 : f32
    %280 = vector.broadcast %cst_107 : f32 to vector<8x128xf32>
    %281 = arith.addf %279, %280 : vector<8x128xf32>
    %282 = vector.extract_strided_slice %266 {offsets = [0, 384], sizes = [8, 128], strides = [1, 1]} : vector<8x512xf32> to vector<8x128xf32>
    %283 = arith.mulf %276, %250 : vector<8x128xf32>
    %284 = arith.mulf %271, %282 : vector<8x128xf32>
    %285 = arith.addf %283, %284 : vector<8x128xf32>
    %286 = math.tanh %285 : vector<8x128xf32>
    %287 = arith.mulf %281, %286 : vector<8x128xf32>
    %288 = vector.shape_cast %287 : vector<8x128xf32> to vector<1x8x128xf32>
    %289 = arith.index_cast %c7_i32 : i32 to index
    %c0_108 = arith.constant 0 : index
    %c0_109 = arith.constant 0 : index
    %290 = vector.load %arg3[%289, %c0_108, %c0_109] : memref<8x8x128xf32, #tpu.memory_space<vmem>>, vector<1x8x128xf32>
    tpu.vector_store %arg3[%289, %c0_108, %c0_109], %288 {strides = array<i32>} : memref<8x8x128xf32, #tpu.memory_space<vmem>>, vector<1x8x128xf32>,
    %c8_i32 = arith.constant 8 : i32
    %c0_110 = arith.constant 0 : index
    %c0_111 = arith.constant 0 : index
    %291 = vector.load %arg6[%c0_110, %c0_111] : memref<8x128xf32, #tpu.memory_space<vmem>>, vector<8x128xf32>
    tpu.vector_store %arg6[%c0_110, %c0_111], %287 {strides = array<i32>} : memref<8x128xf32, #tpu.memory_space<vmem>>, vector<8x128xf32>,
    %c0_112 = arith.constant 0 : index
    %c0_113 = arith.constant 0 : index
    %292 = vector.load %arg7[%c0_112, %c0_113] : memref<8x128xf32, #tpu.memory_space<vmem>>, vector<8x128xf32>
    tpu.vector_store %arg7[%c0_112, %c0_113], %285 {strides = array<i32>} : memref<8x128xf32, #tpu.memory_space<vmem>>, vector<8x128xf32>,
    %c0_i32_114 = arith.constant 0 : i32
    %293 = arith.cmpi eq, %arg0, %c0_i32_114 : i32
    %294 = arith.extui %293 : i1 to i32
    %c0_i32_115 = arith.constant 0 : i32
    %295 = arith.cmpi ne, %294, %c0_i32_115 : i32
    scf.if %295 {
      %c0_116 = arith.constant 0 : index
      %c0_117 = arith.constant 0 : index
      %296 = vector.load %arg4[%c0_116, %c0_117] : memref<8x128xf32, #tpu.memory_space<vmem>>, vector<8x128xf32>
      tpu.vector_store %arg4[%c0_116, %c0_117], %287 {strides = array<i32>} : memref<8x128xf32, #tpu.memory_space<vmem>>, vector<8x128xf32>,
      %c0_118 = arith.constant 0 : index
      %c0_119 = arith.constant 0 : index
      %297 = vector.load %arg5[%c0_118, %c0_119] : memref<8x128xf32, #tpu.memory_space<vmem>>, vector<8x128xf32>
      tpu.vector_store %arg5[%c0_118, %c0_119], %285 {strides = array<i32>} : memref<8x128xf32, #tpu.memory_space<vmem>>, vector<8x128xf32>,
    } else {
    }
    return
  }
  func.func @transform_0(%arg0: i32) -> (i32, i32, i32) {
    %c0_i32 = arith.constant 0 : i32
    %c0_i32_0 = arith.constant 0 : i32
    %c0_i32_1 = arith.constant 0 : i32
    return %arg0, %c0_i32, %c0_i32_0 : i32, i32, i32
  }
  func.func @transform_1(%arg0: i32) -> (i32, i32) {
    %c0_i32 = arith.constant 0 : i32
    %c0_i32_0 = arith.constant 0 : i32
    %c0_i32_1 = arith.constant 0 : i32
    return %c0_i32, %c0_i32_0 : i32, i32
  }
  func.func @transform_2(%arg0: i32) -> (i32, i32, i32) {
    %c0_i32 = arith.constant 0 : i32
    %c0_i32_0 = arith.constant 0 : i32
    %c0_i32_1 = arith.constant 0 : i32
    return %arg0, %c0_i32, %c0_i32_0 : i32, i32, i32
  }
  func.func @transform_3(%arg0: i32) -> (i32, i32) {
    %c0_i32 = arith.constant 0 : i32
    %c0_i32_0 = arith.constant 0 : i32
    %c0_i32_1 = arith.constant 0 : i32
    return %c0_i32, %c0_i32_0 : i32, i32
  }
  func.func @transform_4(%arg0: i32) -> (i32, i32) {
    %c0_i32 = arith.constant 0 : i32
    %c0_i32_0 = arith.constant 0 : i32
    %c0_i32_1 = arith.constant 0 : i32
    return %c0_i32, %c0_i32_0 : i32, i32
  }
}

</mosaic_0001>

<bundles_post_ra>
// kernel: tpu_custom_call.1
= control target key start
LH: loop header
LB: loop body
LE: loop exit
PB: predicated region body
PF: predicated region fallthrough
CT: control target
= control target key end

     0   :  { %10 = vsyncpa [#allocation5], 0  ;;  %s3667_s0 = inlined_call_operand.hbm [shape: bf16[8,8,512], index: 0, kind: input, shape index: {}]   ;;  %s3668_s1 = inlined_call_operand.hbm [shape: bf16[128,512], index: 1, kind: input, shape index: {}]   ;;  %s3669_s2 = inlined_call_operand.hbm [shape: f32[8,8,128], index: 2, kind: output, shape index: {0}]   ;;  %s3670_s3 = inlined_call_operand.hbm [shape: f32[8,128], index: 3, kind: output, shape index: {1}]   ;;  %s3671_s4 = inlined_call_operand.hbm [shape: f32[8,128], index: 4, kind: output, shape index: {2}]  }
   0x1   :  { %11 = vsyncpa [#allocation8], 0 }
   0x2   :  { %12 = vsyncpa [#allocation6], 0 }
   0x3   :  { %13 = vsyncpa [#allocation11], 0  ;;  %s3133_s15 = smov [#allocation4]   ;;  %s3015_s19 = scalar_lea.hbm %s3667_s0, 2048 }
   0x4   :  { %s19_s16 = sshll.u32 %s3133_s15, 4  ;;  %p3016_p0 = scmp.ne.s32.totalorder %s3667_s0, %s3015_s19  ;;  %s20_s16 = int_to_ptr.vmem [resolvable:$true] %s19_s16 }
   0x5   :  { %p3019_p1 = scmp.lt.u32.totalorder %s3015_s19, %s3667_s0 }
   0x7   :  { %p3021_p2 = pnand %p3019_p1, %p3016_p0 }
   0x9   :  { %3024 = shalt.err (!%p3021_p2)
}
   0xa   :  { %s3025_s24 = scalar_lea.vmem %s20_s16, 2048  ;;  %p3030_p4 = scmp.lt.s32.totalorder %s20_s16, %s20_s16 }
   0xb   :  { %p3026_p3 = scmp.ne.s32.totalorder %s20_s16, %s3025_s24  ;;  %p3031_p5 = scmp.lt.s32.totalorder %s3025_s24, %s3025_s24 }
   0xd   :  { %p3032_p6 = por %p3031_p5, %p3030_p4 }
   0xf   :  { %p3033_p7 = pnand %p3032_p6, %p3026_p3 }
  0x11   :  { %3036 = shalt.err (!%p3033_p7)
}
  0x12   :  { %s3134_s25 = smov 256   ;;  %s3135_s26 = smov 16  }
  0x13   :  { %25 = dma.hbm_to_vmem [thread:$0]  %s3667_s0, 2048, %s20_s16, [#allocation5], %s3134_s25, %s3134_s25, %s3135_s26  }
  0x14   :  { %s3136_s29 = smov [#allocation7]   ;;  %s3037_s7 = scalar_lea.hbm %s3668_s1, 4096 }
  0x15   :  { %s31_s30 = sshll.u32 %s3136_s29, 4  ;;  %p3038_p8 = scmp.ne.s32.totalorder %s3668_s1, %s3037_s7  ;;  %s32_s30 = int_to_ptr.vmem [resolvable:$true] %s31_s30 }
  0x16   :  { %p3041_p9 = scmp.lt.u32.totalorder %s3037_s7, %s3668_s1 }
  0x18   :  { %p3043_p10 = pnand %p3041_p9, %p3038_p8 }
  0x1a   :  { %3046 = shalt.err (!%p3043_p10)
}
  0x1b   :  { %s3047_s12 = scalar_lea.vmem %s32_s30, 4096  ;;  %p3052_p12 = scmp.lt.s32.totalorder %s32_s30, %s32_s30 }
  0x1c   :  { %p3048_p11 = scmp.ne.s32.totalorder %s32_s30, %s3047_s12  ;;  %p3053_p13 = scmp.lt.s32.totalorder %s3047_s12, %s3047_s12 }
  0x1e   :  { %p3054_p0 = por %p3053_p13, %p3052_p12 }
  0x20   :  { %p3055_p1 = pnand %p3054_p0, %p3048_p11 }
  0x22   :  { %3058 = shalt.err (!%p3055_p1)
}
  0x23   :  { %37 = dma.hbm_to_vmem [thread:$0]  %s3668_s1, 4096, %s32_s30, [#allocation8], %s3134_s25, %s3134_s25, %s3135_s26  }
  0x24   :  { %3125 = dma.done.wait [#allocation5], 2048  }
  0x25   :  { %3126 = vsyncadd [#allocation5], 4294965248 }
  0x26   :  { %3127 = dma.done.wait [#allocation8], 4096  }
  0x27   :  { %3128 = vsyncadd [#allocation8], 4294963200  ;;  %v3137_v0 = vmov 0   ;;  %v3195_v1 = vld [vmem:[#allocation7 + $0x4] ss:$16 sps:$4 sm:$0xff]   ;;  %v3138_v33 = vmov 0.0|0.0  }
  0x28   :  { %297 = vmatprep.mubr.bf16.mxu0 %v3137_v0  ;;  %338 = vmatprep.mubr.bf16.mxu1 %v3137_v0  ;;  %v3197_v2 = vld [vmem:[#allocation7] ss:$16 sps:$4 sm:$0xff]   ;;  %v3200_v3 = vld [vmem:[#allocation7 + $0xc] ss:$16 sps:$4 sm:$0xff]   ;;  %v3203_v4 = vld [vmem:[#allocation7 + $0x24] ss:$16 sps:$4 sm:$0xff]  }
  0x29   :  { %265 = vmatprep.subr.bf16.mxu0 %v3195_v1  ;;  %v3205_v5 = vld [vmem:[#allocation7 + $0x8] ss:$16 sps:$4 sm:$0xff]   ;;  %v3207_v6 = vld [vmem:[#allocation7 + $0x20] ss:$16 sps:$4 sm:$0xff]   ;;  %306 = vmatprep.subr.bf16.mxu1 %v3200_v3  ;;  %v3210_v7 = vld [vmem:[#allocation7 + $0x2c] ss:$16 sps:$4 sm:$0xff]  }
  0x2a   :  { %266 = vmatpush1.bf16.msra.mxu0 %v3197_v2  ;;  %307 = vmatpush1.bf16.msra.mxu1 %v3205_v5  ;;  %v3214_v8 = vld [vmem:[#allocation7 + $0x44] ss:$16 sps:$4 sm:$0xff]   ;;  %v3217_v9 = vld [vmem:[#allocation7 + $0x28] ss:$16 sps:$4 sm:$0xff]   ;;  %v3219_v10 = vld [vmem:[#allocation7 + $0x40] ss:$16 sps:$4 sm:$0xff]  }
  0x2b   :  { %267 = vmatprep.subr.bf16.mxu0 %v3203_v4  ;;  %308 = vmatprep.subr.bf16.mxu1 %v3210_v7  ;;  %v3222_v11 = vld [vmem:[#allocation7 + $0x4c] ss:$16 sps:$4 sm:$0xff]   ;;  %v3225_v12 = vld [vmem:[#allocation7 + $0x64] ss:$16 sps:$4 sm:$0xff]   ;;  %v3228_v13 = vld [vmem:[#allocation7 + $0x48] ss:$16 sps:$4 sm:$0xff]  }
  0x2c   :  { %v3231_v14 = vld [vmem:[#allocation7 + $0x6c] ss:$16 sps:$4 sm:$0xff]   ;;  %v3234_v15 = vld [vmem:[#allocation7 + $0x60] ss:$16 sps:$4 sm:$0xff]   ;;  %v3237_v16 = vld [vmem:[#allocation7 + $0x84] ss:$16 sps:$4 sm:$0xff]  }
  0x2d   :  { %v3240_v17 = vld [vmem:[#allocation7 + $0x68] ss:$16 sps:$4 sm:$0xff]   ;;  %v3243_v18 = vld [vmem:[#allocation7 + $0x8c] ss:$16 sps:$4 sm:$0xff]   ;;  %v3246_v19 = vld [vmem:[#allocation7 + $0x80] ss:$16 sps:$4 sm:$0xff]  }
  0x2e   :  { %268 = vmatpush1.bf16.msra.mxu0 %v3207_v6  ;;  %309 = vmatpush1.bf16.msra.mxu1 %v3217_v9  ;;  %v3249_v20 = vld [vmem:[#allocation7 + $0xa4] ss:$16 sps:$4 sm:$0xff]   ;;  %v3252_v21 = vld [vmem:[#allocation7 + $0x88] ss:$16 sps:$4 sm:$0xff]   ;;  %v3255_v22 = vld [vmem:[#allocation7 + $0xac] ss:$16 sps:$4 sm:$0xff]  }
  0x2f   :  { %269 = vmatprep.subr.bf16.mxu0 %v3214_v8  ;;  %310 = vmatprep.subr.bf16.mxu1 %v3222_v11  ;;  %v3258_v23 = vld [vmem:[#allocation7 + $0xa0] ss:$16 sps:$4 sm:$0xff]   ;;  %v3260_v24 = vld [vmem:[#allocation7 + $0xc4] ss:$16 sps:$4 sm:$0xff]   ;;  %v3263_v25 = vld [vmem:[#allocation7 + $0xa8] ss:$16 sps:$4 sm:$0xff]  }
  0x30   :  { %v3266_v26 = vld [vmem:[#allocation7 + $0xc0] ss:$16 sps:$4 sm:$0xff]   ;;  %v3268_v27 = vld [vmem:[#allocation7 + $0xcc] ss:$16 sps:$4 sm:$0xff]   ;;  %v3271_v28 = vld [vmem:[#allocation7 + $0xe4] ss:$16 sps:$4 sm:$0xff]  }
  0x31   :  { %v3274_v29 = vld [vmem:[#allocation7 + $0xc8] ss:$16 sps:$4 sm:$0xff]   ;;  %v3277_v30 = vld [vmem:[#allocation7 + $0xec] ss:$16 sps:$4 sm:$0xff]   ;;  %v3280_v31 = vld [vmem:[#allocation7 + $0xe0] ss:$16 sps:$4 sm:$0xff]  }
  0x32   :  { %270 = vmatpush1.bf16.msra.mxu0 %v3219_v10  ;;  %311 = vmatpush1.bf16.msra.mxu1 %v3228_v13  ;;  %v3284_v32 = vld [vmem:[#allocation7 + $0xe8] ss:$16 sps:$4 sm:$0xff]   ;;  %v66_v34 = vld [vmem:[#allocation4] sm:$0xff]  ;;  %s3139_s1 = smov [#allocation10]   ;;  %s3140_s15 = smov [#allocation9]  }
  0x33   :  { %271 = vmatprep.subr.bf16.mxu0 %v3225_v12  ;;  %312 = vmatprep.subr.bf16.mxu1 %v3231_v14  ;;  %v68_v35 = vunpack.c.l.bf16 %v66_v34  ;;  %v67_v36 = vld [vmem:[#allocation4 + $0x8] sm:$0xff]  ;;  %v69_v37 = vunpack.c.h.bf16 %v66_v34  ;;  %s2545_s14 = sshll.u32 %s3139_s1, 4  ;;  %s2532_s16 = sshll.u32 %s3140_s15, 4  ;;  %s2546_s14 = int_to_ptr.vmem [resolvable:$true] %s2545_s14  ;;  %s3617_s16 = int_to_ptr.vmem [resolvable:$true] %s2532_s16 }
  0x34   :  { %v71_v39 = vunpack.c.h.bf16 %v67_v36  ;;  %v70_v51 = vunpack.c.l.bf16 %v67_v36  ;;  %s3141_s17 = smov [#allocation12]   ;;  %s3059_s19 = scalar_lea.vmem %s2546_s14, 128 }
  0x35   :  { %s2555_s18 = sshll.u32 %s3141_s17, 4  ;;  %p3060_p2 = scmp.ne.s32.totalorder %s2546_s14, %s3059_s19  ;;  %s3619_s18 = int_to_ptr.vmem [resolvable:$true] %s2555_s18 }
  0x36   :  { %272 = vmatpush1.bf16.msra.mxu0 %v3234_v15  ;;  %313 = vmatpush1.bf16.msra.mxu1 %v3240_v17  ;;  %p3064_p3 = scmp.lt.s32.totalorder %s2546_s14, %s2546_s14  ;;  %p3065_p4 = scmp.lt.s32.totalorder %s3059_s19, %s3059_s19 }
  0x37   :  { %273 = vmatprep.subr.bf16.mxu0 %v3237_v16  ;;  %314 = vmatprep.subr.bf16.mxu1 %v3243_v18 }
  0x38   :  { %p3066_p5 = por %p3065_p4, %p3064_p3 }
  0x3a   :  { %274 = vmatpush1.bf16.msra.mxu0 %v3246_v19  ;;  %315 = vmatpush1.bf16.msra.mxu1 %v3252_v21  ;;  %p3067_p6 = pnand %p3066_p5, %p3060_p2 }
  0x3b   :  { %275 = vmatprep.subr.bf16.mxu0 %v3249_v20  ;;  %316 = vmatprep.subr.bf16.mxu1 %v3255_v22 }
  0x3e   :  { %276 = vmatpush1.bf16.msra.mxu0 %v3258_v23  ;;  %317 = vmatpush1.bf16.msra.mxu1 %v3263_v25 }
  0x3f   :  { %277 = vmatprep.subr.bf16.mxu0 %v3260_v24  ;;  %318 = vmatprep.subr.bf16.mxu1 %v3268_v27 }
  0x42   :  { %278 = vmatpush1.bf16.msra.mxu0 %v3266_v26  ;;  %319 = vmatpush1.bf16.msra.mxu1 %v3274_v29 }
  0x43   :  { %279 = vmatprep.subr.bf16.mxu0 %v3271_v28  ;;  %320 = vmatprep.subr.bf16.mxu1 %v3277_v30 }
  0x46   :  { %280 = vmatpush1.bf16.msra.mxu0 %v3280_v31  ;;  %321 = vmatpush1.bf16.msra.mxu1 %v3284_v32 }
  0x47   :  { %571 = vmatprep.subr.bf16.mxu0 %v3195_v1  ;;  %612 = vmatprep.subr.bf16.mxu1 %v3200_v3 }
  0x49   :  { %298 = vmatmul.mubr.bf16.vlgmr.msra.gmra.mrb[0].mxu0 %v3138_v33  ;;  %339 = vmatmul.mubr.bf16.vlgmr.msra.gmra.mrb[0].mxu1 %v3138_v33 }
  0x4a   :  { %572 = vmatpush1.bf16.msra.mxu0 %v3197_v2  ;;  %603 = vmatprep.mubr.bf16.mxu0 %v3137_v0 }
  0x4b   :  { %573 = vmatprep.subr.bf16.mxu0 %v3203_v4  ;;  %613 = vmatpush1.bf16.msra.mxu1 %v3205_v5 }
  0x4c   :  { %644 = vmatprep.mubr.bf16.mxu1 %v3137_v0  ;;  %614 = vmatprep.subr.bf16.mxu1 %v3210_v7 }
  0x4e   :  { %574 = vmatpush1.bf16.msra.mxu0 %v3207_v6 }
  0x4f   :  { %575 = vmatprep.subr.bf16.mxu0 %v3214_v8  ;;  %615 = vmatpush1.bf16.msra.mxu1 %v3217_v9 }
  0x50   :  { %616 = vmatprep.subr.bf16.mxu1 %v3222_v11 }
  0x52   :  { %576 = vmatpush1.bf16.msra.mxu0 %v3219_v10 }
  0x53   :  { %577 = vmatprep.subr.bf16.mxu0 %v3225_v12  ;;  %617 = vmatpush1.bf16.msra.mxu1 %v3228_v13 }
  0x54   :  { %618 = vmatprep.subr.bf16.mxu1 %v3231_v14 }
  0x56   :  { %578 = vmatpush1.bf16.msra.mxu0 %v3234_v15 }
  0x57   :  { %579 = vmatprep.subr.bf16.mxu0 %v3237_v16  ;;  %619 = vmatpush1.bf16.msra.mxu1 %v3240_v17 }
  0x58   :  { %620 = vmatprep.subr.bf16.mxu1 %v3243_v18 }
  0x5a   :  { %580 = vmatpush1.bf16.msra.mxu0 %v3246_v19 }
  0x5b   :  { %581 = vmatprep.subr.bf16.mxu0 %v3249_v20  ;;  %621 = vmatpush1.bf16.msra.mxu1 %v3252_v21 }
  0x5c   :  { %622 = vmatprep.subr.bf16.mxu1 %v3255_v22 }
  0x5e   :  { %582 = vmatpush1.bf16.msra.mxu0 %v3258_v23 }
  0x5f   :  { %583 = vmatprep.subr.bf16.mxu0 %v3260_v24  ;;  %623 = vmatpush1.bf16.msra.mxu1 %v3263_v25 }
  0x60   :  { %624 = vmatprep.subr.bf16.mxu1 %v3268_v27 }
  0x62   :  { %584 = vmatpush1.bf16.msra.mxu0 %v3266_v26 }
  0x63   :  { %585 = vmatprep.subr.bf16.mxu0 %v3271_v28  ;;  %625 = vmatpush1.bf16.msra.mxu1 %v3274_v29 }
  0x64   :  { %626 = vmatprep.subr.bf16.mxu1 %v3277_v30 }
  0x66   :  { %586 = vmatpush1.bf16.msra.mxu0 %v3280_v31 }
  0x67   :  { %878 = vmatprep.subr.bf16.mxu0 %v3195_v1  ;;  %627 = vmatpush1.bf16.msra.mxu1 %v3284_v32 }
  0x68   :  { %919 = vmatprep.subr.bf16.mxu1 %v3200_v3 }
 0x11c   :  { %v299_v38 = vpop.f32.mrb[0].mxu0  ;;  %v340_v44 = vpop.f32.mrb[0].mxu1 }
 0x11d   :  { %v347_v40 = vadd.f32 %v299_v38, %v68_v35  ;;  %v301_v41 = vpop.f32.mrb[1].mxu0  ;;  %v342_v47 = vpop.f32.mrb[1].mxu1  ;;  %v349_v53 = vadd.f32 %v340_v44, %v70_v51 }
 0x11e   :  { %v348_v42 = vadd.f32 %v301_v41, %v69_v37  ;;  %v303_v43 = vpop.f32.mrb[2].mxu0  ;;  %v350_v49 = vadd.f32 %v342_v47, %v71_v39  ;;  %v344_v50 = vpop.f32.mrb[2].mxu1 }
 0x11f   :  { %v351_v45 = vmul.f32 0.5, %v347_v40  ;;  %v304_v46 = vpop.f32.mrb[3].mxu0  ;;  %v345_v52 = vpop.f32.mrb[3].mxu1  ;;  %v353_v54 = vmul.f32 0.5, %v349_v53  ;;  %v372_v40 = vld [vmem:[#allocation4 + $0x10] sm:$0xff] }
 0x120   :  { %v352_v48 = vmul.f32 0.5, %v348_v42  ;;  %v374_v41 = vunpack.c.l.bf16 %v372_v40  ;;  %v373_v42 = vld [vmem:[#allocation4 + $0x18] sm:$0xff]  ;;  %v375_v43 = vunpack.c.h.bf16 %v372_v40 }
 0x121   :  { %2935 = vtanh.f32 %v351_v45 }
 0x122   :  { %2937 = vtanh.f32 %v352_v48  ;;  %v377_v48 = vunpack.c.h.bf16 %v373_v42 }
 0x123   :  { %2939 = vtanh.f32 %v350_v49 }
 0x124   :  { %2941 = vtanh.f32 %v353_v54 }
 0x12b   :  { %v2936_v55 = vpop.eup %2935 }
 0x12c   :  { %v2938_v56 = vpop.eup %2937  ;;  %v359_v57 = vmul.f32 0.5, %v2936_v55 }
 0x12d   :  { %v361_v58 = vmul.f32 0.5, %v2938_v56  ;;  %v2940_v59 = vpop.eup %2939 }
 0x12e   :  { %v360_v60 = vadd.f32 0.5, %v359_v57  ;;  %v2942_v34 = vpop.eup %2941 }
 0x12f   :  { %v362_v61 = vadd.f32 0.5, %v361_v58  ;;  %v363_v35 = vmul.f32 0.5, %v2942_v34 }
 0x130   :  { %v366_v62 = vmul.f32 %v2940_v59, %v360_v60 }
 0x131   :  { %v365_v63 = vmul.f32 0.0, %v362_v61  ;;  %v364_v36 = vadd.f32 0.5, %v363_v35 }
 0x133   :  { %v3327_v33 = vadd.f32 %v366_v62, %v365_v63 }
 0x135   :  { %2943 = vtanh.f32 %v3327_v33 }
 0x13f   :  { %v2944_v37 = vpop.eup %2943 }
 0x140   :  { %v369_v38 = vmul.f32 %v2944_v37, %v364_v36 }
 0x142   :  { %370 = vst [vmem:[#allocation9] sm:$0xff] %v369_v38  ;;  %v378_v39 = vpack.c.bf16 %v369_v38, %v369_v38 }
 0x144   :  { %604 = vmatmul.mubr.bf16.vlgmr.msra.gmra.mrb[4].mxu0 %v378_v39  ;;  %645 = vmatmul.mubr.bf16.vlgmr.msra.gmra.mrb[4].mxu1 %v378_v39 }
 0x145   :  { %879 = vmatpush1.bf16.msra.mxu0 %v3197_v2  ;;  %920 = vmatpush1.bf16.msra.mxu1 %v3205_v5 }
 0x146   :  { %880 = vmatprep.subr.bf16.mxu0 %v3203_v4  ;;  %921 = vmatprep.subr.bf16.mxu1 %v3210_v7 }
 0x147   :  { %910 = vmatprep.mubr.bf16.mxu0 %v3137_v0  ;;  %951 = vmatprep.mubr.bf16.mxu1 %v3137_v0 }
 0x149   :  { %881 = vmatpush1.bf16.msra.mxu0 %v3207_v6  ;;  %922 = vmatpush1.bf16.msra.mxu1 %v3217_v9 }
 0x14a   :  { %882 = vmatprep.subr.bf16.mxu0 %v3214_v8  ;;  %923 = vmatprep.subr.bf16.mxu1 %v3222_v11 }
 0x14d   :  { %883 = vmatpush1.bf16.msra.mxu0 %v3219_v10  ;;  %924 = vmatpush1.bf16.msra.mxu1 %v3228_v13 }
 0x14e   :  { %884 = vmatprep.subr.bf16.mxu0 %v3225_v12  ;;  %925 = vmatprep.subr.bf16.mxu1 %v3231_v14 }
 0x151   :  { %885 = vmatpush1.bf16.msra.mxu0 %v3234_v15  ;;  %926 = vmatpush1.bf16.msra.mxu1 %v3240_v17 }
 0x152   :  { %886 = vmatprep.subr.bf16.mxu0 %v3237_v16  ;;  %927 = vmatprep.subr.bf16.mxu1 %v3243_v18 }
 0x155   :  { %887 = vmatpush1.bf16.msra.mxu0 %v3246_v19  ;;  %928 = vmatpush1.bf16.msra.mxu1 %v3252_v21 }
 0x156   :  { %888 = vmatprep.subr.bf16.mxu0 %v3249_v20  ;;  %929 = vmatprep.subr.bf16.mxu1 %v3255_v22 }
 0x159   :  { %889 = vmatpush1.bf16.msra.mxu0 %v3258_v23  ;;  %930 = vmatpush1.bf16.msra.mxu1 %v3263_v25 }
 0x15a   :  { %890 = vmatprep.subr.bf16.mxu0 %v3260_v24  ;;  %931 = vmatprep.subr.bf16.mxu1 %v3268_v27 }
 0x15d   :  { %891 = vmatpush1.bf16.msra.mxu0 %v3266_v26  ;;  %932 = vmatpush1.bf16.msra.mxu1 %v3274_v29 }
 0x15e   :  { %892 = vmatprep.subr.bf16.mxu0 %v3271_v28  ;;  %933 = vmatprep.subr.bf16.mxu1 %v3277_v30 }
 0x161   :  { %893 = vmatpush1.bf16.msra.mxu0 %v3280_v31  ;;  %934 = vmatpush1.bf16.msra.mxu1 %v3284_v32 }
 0x162   :  { %1185 = vmatprep.subr.bf16.mxu0 %v3195_v1  ;;  %1226 = vmatprep.subr.bf16.mxu1 %v3200_v3  ;;  %v376_v3 = vunpack.c.l.bf16 %v373_v42 }
 0x217   :  { %v605_v44 = vpop.f32.mrb[4].mxu0  ;;  %v646_v45 = vpop.f32.mrb[4].mxu1 }
 0x218   :  { %v653_v46 = vadd.f32 %v605_v44, %v374_v41  ;;  %v607_v47 = vpop.f32.mrb[5].mxu0  ;;  %v648_v49 = vpop.f32.mrb[5].mxu1  ;;  %v655_v57 = vadd.f32 %v646_v45, %v376_v3  ;;  %v3424_v3 = vld [vmem:[#allocation7 + $0x28] ss:$16 sps:$4 sm:$0xff]  }
 0x219   :  { %v654_v50 = vadd.f32 %v607_v47, %v375_v43  ;;  %v609_v51 = vpop.f32.mrb[6].mxu0  ;;  %v650_v52 = vpop.f32.mrb[6].mxu1  ;;  %v656_v1 = vadd.f32 %v648_v49, %v377_v48 }
 0x21a   :  { %v657_v53 = vmul.f32 0.5, %v653_v46  ;;  %v610_v54 = vpop.f32.mrb[7].mxu0  ;;  %v651_v55 = vpop.f32.mrb[7].mxu1  ;;  %v659_v58 = vmul.f32 0.5, %v655_v57  ;;  %v3406_v51 = vld [vmem:[#allocation7 + $0x4] ss:$16 sps:$4 sm:$0xff]  }
 0x21b   :  { %v658_v56 = vmul.f32 0.5, %v654_v50  ;;  %v3408_v52 = vld [vmem:[#allocation7 + $0xc] ss:$16 sps:$4 sm:$0xff]   ;;  %v3412_v54 = vld [vmem:[#allocation7 + $0x8] ss:$16 sps:$4 sm:$0xff]  }
 0x21c   :  { %2945 = vtanh.f32 %v657_v53  ;;  %v3410_v53 = vld [vmem:[#allocation7] ss:$16 sps:$4 sm:$0xff]   ;;  %v3418_v55 = vld [vmem:[#allocation7 + $0x24] ss:$16 sps:$4 sm:$0xff]  }
 0x21d   :  { %2947 = vtanh.f32 %v658_v56  ;;  %v3420_v56 = vld [vmem:[#allocation7 + $0x2c] ss:$16 sps:$4 sm:$0xff]   ;;  %v3430_v57 = vld [vmem:[#allocation7 + $0x44] ss:$16 sps:$4 sm:$0xff]  }
 0x21e   :  { %2949 = vtanh.f32 %v656_v1  ;;  %v3422_v1 = vld [vmem:[#allocation7 + $0x20] ss:$16 sps:$4 sm:$0xff]  }
 0x21f   :  { %2951 = vtanh.f32 %v659_v58  ;;  %v3432_v58 = vld [vmem:[#allocation7 + $0x4c] ss:$16 sps:$4 sm:$0xff]  }
 0x226   :  { %v2946_v59 = vpop.eup %2945 }
 0x227   :  { %v665_v60 = vmul.f32 0.5, %v2946_v59  ;;  %v2948_v61 = vpop.eup %2947  ;;  %v3434_v59 = vld [vmem:[#allocation7 + $0x40] ss:$16 sps:$4 sm:$0xff]  }
 0x228   :  { %v667_v63 = vmul.f32 0.5, %v2948_v61  ;;  %v2950_v34 = vpop.eup %2949  ;;  %v3442_v61 = vld [vmem:[#allocation7 + $0x64] ss:$16 sps:$4 sm:$0xff]  }
 0x229   :  { %v666_v62 = vadd.f32 0.5, %v665_v60  ;;  %v2952_v39 = vpop.eup %2951  ;;  %v3436_v60 = vld [vmem:[#allocation7 + $0x48] ss:$16 sps:$4 sm:$0xff]  }
 0x22a   :  { %v668_v35 = vadd.f32 0.5, %v667_v63  ;;  %v669_v40 = vmul.f32 0.5, %v2952_v39  ;;  %v3446_v63 = vld [vmem:[#allocation7 + $0x60] ss:$16 sps:$4 sm:$0xff]  }
 0x22b   :  { %v672_v36 = vmul.f32 %v2950_v34, %v666_v62  ;;  %v3444_v62 = vld [vmem:[#allocation7 + $0x6c] ss:$16 sps:$4 sm:$0xff]   ;;  %v3448_v34 = vld [vmem:[#allocation7 + $0x68] ss:$16 sps:$4 sm:$0xff]   ;;  %v3466_v39 = vld [vmem:[#allocation7 + $0xa0] ss:$16 sps:$4 sm:$0xff]  }
 0x22c   :  { %v671_v37 = vmul.f32 %v668_v35, %v3327_v33  ;;  %v670_v41 = vadd.f32 0.5, %v669_v40  ;;  %v3454_v35 = vld [vmem:[#allocation7 + $0x84] ss:$16 sps:$4 sm:$0xff]  }
 0x22d   :  { %v3468_v40 = vld [vmem:[#allocation7 + $0xa4] ss:$16 sps:$4 sm:$0xff]  }
 0x22e   :  { %v3365_v38 = vadd.f32 %v672_v36, %v671_v37  ;;  %v3456_v36 = vld [vmem:[#allocation7 + $0x8c] ss:$16 sps:$4 sm:$0xff]   ;;  %v3458_v37 = vld [vmem:[#allocation7 + $0x80] ss:$16 sps:$4 sm:$0xff]  }
 0x230   :  { %2953 = vtanh.f32 %v3365_v38 }
 0x23a   :  { %v2954_v42 = vpop.eup %2953 }
 0x23b   :  { %v675_v43 = vmul.f32 %v2954_v42, %v670_v41  ;;  %v3470_v41 = vld [vmem:[#allocation7 + $0xa8] ss:$16 sps:$4 sm:$0xff]   ;;  %v3472_v42 = vld [vmem:[#allocation7 + $0xac] ss:$16 sps:$4 sm:$0xff]  }
 0x23d   :  { %677 = vst [vmem:[#allocation9 + $0x8] sm:$0xff] %v675_v43  ;;  %v685_v44 = vpack.c.bf16 %v675_v43, %v675_v43  ;;  %v3474_v43 = vld [vmem:[#allocation7 + $0xc4] ss:$16 sps:$4 sm:$0xff]  }
 0x23f   :  { %911 = vmatmul.mubr.bf16.vlgmr.msra.gmra.mrb[8].mxu0 %v685_v44  ;;  %952 = vmatmul.mubr.bf16.vlgmr.msra.gmra.mrb[8].mxu1 %v685_v44  ;;  %v3477_v44 = vld [vmem:[#allocation7 + $0xcc] ss:$16 sps:$4 sm:$0xff]  }
 0x240   :  { %1186 = vmatpush1.bf16.msra.mxu0 %v3197_v2  ;;  %1227 = vmatpush1.bf16.msra.mxu1 %v3205_v5  ;;  %v679_v2 = vld [vmem:[#allocation4 + $0x20] sm:$0xff]  ;;  %v680_v5 = vld [vmem:[#allocation4 + $0x28] sm:$0xff] }
 0x241   :  { %1187 = vmatprep.subr.bf16.mxu0 %v3203_v4  ;;  %1228 = vmatprep.subr.bf16.mxu1 %v3210_v7  ;;  %v681_v4 = vunpack.c.l.bf16 %v679_v2 }
 0x242   :  { %1217 = vmatprep.mubr.bf16.mxu0 %v3137_v0  ;;  %1258 = vmatprep.mubr.bf16.mxu1 %v3137_v0 }
 0x244   :  { %1188 = vmatpush1.bf16.msra.mxu0 %v3207_v6  ;;  %1229 = vmatpush1.bf16.msra.mxu1 %v3217_v9  ;;  %v682_v6 = vunpack.c.h.bf16 %v679_v2  ;;  %v3482_v2 = vld [vmem:[#allocation7 + $0xc0] ss:$16 sps:$4 sm:$0xff]  }
 0x245   :  { %1189 = vmatprep.subr.bf16.mxu0 %v3214_v8  ;;  %1230 = vmatprep.subr.bf16.mxu1 %v3222_v11  ;;  %v684_v11 = vunpack.c.h.bf16 %v680_v5 }
 0x248   :  { %1190 = vmatpush1.bf16.msra.mxu0 %v3219_v10  ;;  %1231 = vmatpush1.bf16.msra.mxu1 %v3228_v13 }
 0x249   :  { %1191 = vmatprep.subr.bf16.mxu0 %v3225_v12  ;;  %1232 = vmatprep.subr.bf16.mxu1 %v3231_v14 }
 0x24c   :  { %1192 = vmatpush1.bf16.msra.mxu0 %v3234_v15  ;;  %1233 = vmatpush1.bf16.msra.mxu1 %v3240_v17 }
 0x24d   :  { %1193 = vmatprep.subr.bf16.mxu0 %v3237_v16  ;;  %1234 = vmatprep.subr.bf16.mxu1 %v3243_v18 }
 0x250   :  { %1194 = vmatpush1.bf16.msra.mxu0 %v3246_v19  ;;  %1235 = vmatpush1.bf16.msra.mxu1 %v3252_v21  ;;  %v683_v21 = vunpack.c.l.bf16 %v680_v5  ;;  %v3488_v5 = vld [vmem:[#allocation7 + $0xe4] ss:$16 sps:$4 sm:$0xff]  }
 0x251   :  { %1195 = vmatprep.subr.bf16.mxu0 %v3249_v20  ;;  %1236 = vmatprep.subr.bf16.mxu1 %v3255_v22 }
 0x254   :  { %1196 = vmatpush1.bf16.msra.mxu0 %v3258_v23  ;;  %1237 = vmatpush1.bf16.msra.mxu1 %v3263_v25 }
 0x255   :  { %1197 = vmatprep.subr.bf16.mxu0 %v3260_v24  ;;  %1238 = vmatprep.subr.bf16.mxu1 %v3268_v27 }
 0x258   :  { %1198 = vmatpush1.bf16.msra.mxu0 %v3266_v26  ;;  %1239 = vmatpush1.bf16.msra.mxu1 %v3274_v29 }
 0x259   :  { %1199 = vmatprep.subr.bf16.mxu0 %v3271_v28  ;;  %1240 = vmatprep.subr.bf16.mxu1 %v3277_v30 }
 0x25c   :  { %1200 = vmatpush1.bf16.msra.mxu0 %v3280_v31  ;;  %1241 = vmatpush1.bf16.msra.mxu1 %v3284_v32 }
 0x25d   :  { %1492 = vmatprep.subr.bf16.mxu0 %v3406_v51  ;;  %1533 = vmatprep.subr.bf16.mxu1 %v3408_v52 }
 0x312   :  { %v912_v7 = vpop.f32.mrb[8].mxu0  ;;  %v953_v8 = vpop.f32.mrb[8].mxu1 }
 0x313   :  { %v960_v9 = vadd.f32 %v912_v7, %v681_v4  ;;  %v914_v10 = vpop.f32.mrb[9].mxu0  ;;  %v955_v12 = vpop.f32.mrb[9].mxu1  ;;  %v962_v22 = vadd.f32 %v953_v8, %v683_v21  ;;  %v3484_v4 = vld [vmem:[#allocation7 + $0xc8] ss:$16 sps:$4 sm:$0xff]   ;;  %v3494_v7 = vld [vmem:[#allocation7 + $0xe0] ss:$16 sps:$4 sm:$0xff]  }
 0x314   :  { %v961_v13 = vadd.f32 %v914_v10, %v682_v6  ;;  %v916_v14 = vpop.f32.mrb[10].mxu0  ;;  %v957_v15 = vpop.f32.mrb[10].mxu1  ;;  %v963_v20 = vadd.f32 %v955_v12, %v684_v11  ;;  %v3490_v6 = vld [vmem:[#allocation7 + $0xec] ss:$16 sps:$4 sm:$0xff]   ;;  %v3496_v8 = vld [vmem:[#allocation7 + $0xe8] ss:$16 sps:$4 sm:$0xff]  }
 0x315   :  { %v964_v16 = vmul.f32 0.5, %v960_v9  ;;  %v917_v17 = vpop.f32.mrb[11].mxu0  ;;  %v958_v18 = vpop.f32.mrb[11].mxu1  ;;  %v966_v23 = vmul.f32 0.5, %v962_v22  ;;  %v986_v9 = vld [vmem:[#allocation4 + $0x30] sm:$0xff]  ;;  %v987_v11 = vld [vmem:[#allocation4 + $0x38] sm:$0xff] }
 0x316   :  { %v965_v19 = vmul.f32 0.5, %v961_v13  ;;  %v988_v10 = vunpack.c.l.bf16 %v986_v9  ;;  %v989_v12 = vunpack.c.h.bf16 %v986_v9  ;;  %v991_v17 = vunpack.c.h.bf16 %v987_v11 }
 0x317   :  { %2955 = vtanh.f32 %v964_v16 }
 0x318   :  { %2957 = vtanh.f32 %v965_v19 }
 0x319   :  { %2959 = vtanh.f32 %v963_v20 }
 0x31a   :  { %2961 = vtanh.f32 %v966_v23 }
 0x321   :  { %v2956_v24 = vpop.eup %2955 }
 0x322   :  { %v972_v25 = vmul.f32 0.5, %v2956_v24  ;;  %v2958_v26 = vpop.eup %2957 }
 0x323   :  { %v974_v28 = vmul.f32 0.5, %v2958_v26  ;;  %v2960_v29 = vpop.eup %2959 }
 0x324   :  { %v973_v27 = vadd.f32 0.5, %v972_v25  ;;  %v2962_v45 = vpop.eup %2961 }
 0x325   :  { %v975_v30 = vadd.f32 0.5, %v974_v28  ;;  %v976_v46 = vmul.f32 0.5, %v2962_v45 }
 0x326   :  { %v979_v31 = vmul.f32 %v2960_v29, %v973_v27  ;;  %v990_v27 = vunpack.c.l.bf16 %v987_v11 }
 0x327   :  { %v978_v32 = vmul.f32 %v975_v30, %v3365_v38  ;;  %v977_v47 = vadd.f32 0.5, %v976_v46  ;;  %v3460_v38 = vld [vmem:[#allocation7 + $0x88] ss:$16 sps:$4 sm:$0xff]  }
 0x329   :  { %v3401_v33 = vadd.f32 %v979_v31, %v978_v32 }
 0x32b   :  { %2963 = vtanh.f32 %v3401_v33 }
 0x335   :  { %v2964_v48 = vpop.eup %2963 }
 0x336   :  { %v982_v49 = vmul.f32 %v2964_v48, %v977_v47 }
 0x338   :  { %984 = vst [vmem:[#allocation9 + $0x10] sm:$0xff] %v982_v49  ;;  %v992_v50 = vpack.c.bf16 %v982_v49, %v982_v49 }
 0x33a   :  { %1218 = vmatmul.mubr.bf16.vlgmr.msra.gmra.mrb[12].mxu0 %v992_v50  ;;  %1259 = vmatmul.mubr.bf16.vlgmr.msra.gmra.mrb[12].mxu1 %v992_v50 }
 0x33b   :  { %1524 = vmatprep.mubr.bf16.mxu0 %v3137_v0  ;;  %1565 = vmatprep.mubr.bf16.mxu1 %v3137_v0 }
 0x33c   :  { %1493 = vmatpush1.bf16.msra.mxu0 %v3410_v53  ;;  %1534 = vmatpush1.bf16.msra.mxu1 %v3412_v54 }
 0x33d   :  { %1494 = vmatprep.subr.bf16.mxu0 %v3418_v55  ;;  %1535 = vmatprep.subr.bf16.mxu1 %v3420_v56 }
 0x340   :  { %1495 = vmatpush1.bf16.msra.mxu0 %v3422_v1  ;;  %1536 = vmatpush1.bf16.msra.mxu1 %v3424_v3 }
 0x341   :  { %1496 = vmatprep.subr.bf16.mxu0 %v3430_v57  ;;  %1537 = vmatprep.subr.bf16.mxu1 %v3432_v58 }
 0x344   :  { %1497 = vmatpush1.bf16.msra.mxu0 %v3434_v59  ;;  %1538 = vmatpush1.bf16.msra.mxu1 %v3436_v60 }
 0x345   :  { %1498 = vmatprep.subr.bf16.mxu0 %v3442_v61  ;;  %1539 = vmatprep.subr.bf16.mxu1 %v3444_v62 }
 0x348   :  { %1499 = vmatpush1.bf16.msra.mxu0 %v3446_v63  ;;  %1540 = vmatpush1.bf16.msra.mxu1 %v3448_v34 }
 0x349   :  { %1500 = vmatprep.subr.bf16.mxu0 %v3454_v35  ;;  %1541 = vmatprep.subr.bf16.mxu1 %v3456_v36 }
 0x34c   :  { %1501 = vmatpush1.bf16.msra.mxu0 %v3458_v37  ;;  %1542 = vmatpush1.bf16.msra.mxu1 %v3460_v38 }
 0x34d   :  { %1502 = vmatprep.subr.bf16.mxu0 %v3468_v40  ;;  %1543 = vmatprep.subr.bf16.mxu1 %v3472_v42 }
 0x350   :  { %1503 = vmatpush1.bf16.msra.mxu0 %v3466_v39  ;;  %1544 = vmatpush1.bf16.msra.mxu1 %v3470_v41 }
 0x351   :  { %1504 = vmatprep.subr.bf16.mxu0 %v3474_v43  ;;  %1545 = vmatprep.subr.bf16.mxu1 %v3477_v44 }
 0x354   :  { %1505 = vmatpush1.bf16.msra.mxu0 %v3482_v2  ;;  %1546 = vmatpush1.bf16.msra.mxu1 %v3484_v4 }
 0x355   :  { %1506 = vmatprep.subr.bf16.mxu0 %v3488_v5  ;;  %1547 = vmatprep.subr.bf16.mxu1 %v3490_v6 }
 0x358   :  { %1507 = vmatpush1.bf16.msra.mxu0 %v3494_v7  ;;  %1548 = vmatpush1.bf16.msra.mxu1 %v3496_v8 }
 0x359   :  { %1799 = vmatprep.subr.bf16.mxu0 %v3406_v51  ;;  %1840 = vmatprep.subr.bf16.mxu1 %v3408_v52 }
 0x40d   :  { %v1219_v13 = vpop.f32.mrb[12].mxu0  ;;  %v1260_v14 = vpop.f32.mrb[12].mxu1 }
 0x40e   :  { %v1267_v15 = vadd.f32 %v1219_v13, %v988_v10  ;;  %v1221_v16 = vpop.f32.mrb[13].mxu0  ;;  %v1262_v18 = vpop.f32.mrb[13].mxu1  ;;  %v1269_v28 = vadd.f32 %v1260_v14, %v990_v27 }
 0x40f   :  { %v1268_v19 = vadd.f32 %v1221_v16, %v989_v12  ;;  %v1223_v20 = vpop.f32.mrb[14].mxu0  ;;  %v1264_v21 = vpop.f32.mrb[14].mxu1  ;;  %v1270_v26 = vadd.f32 %v1262_v18, %v991_v17  ;;  %v1294_v17 = vld [vmem:[#allocation4 + $0x48] sm:$0xff] }
 0x410   :  { %v1271_v22 = vmul.f32 0.5, %v1267_v15  ;;  %v1224_v23 = vpop.f32.mrb[15].mxu0  ;;  %v1265_v24 = vpop.f32.mrb[15].mxu1  ;;  %v1273_v29 = vmul.f32 0.5, %v1269_v28 }
 0x411   :  { %v1272_v25 = vmul.f32 0.5, %v1268_v19  ;;  %v1298_v23 = vunpack.c.h.bf16 %v1294_v17 }
 0x412   :  { %2965 = vtanh.f32 %v1271_v22 }
 0x413   :  { %2967 = vtanh.f32 %v1272_v25 }
 0x414   :  { %2969 = vtanh.f32 %v1270_v26 }
 0x415   :  { %2971 = vtanh.f32 %v1273_v29 }
 0x41c   :  { %v2966_v30 = vpop.eup %2965 }
 0x41d   :  { %v1279_v31 = vmul.f32 0.5, %v2966_v30  ;;  %v2968_v32 = vpop.eup %2967 }
 0x41e   :  { %v1281_v46 = vmul.f32 0.5, %v2968_v32  ;;  %v2970_v47 = vpop.eup %2969 }
 0x41f   :  { %v1280_v45 = vadd.f32 0.5, %v1279_v31  ;;  %v2972_v10 = vpop.eup %2971 }
 0x420   :  { %v1282_v48 = vadd.f32 0.5, %v1281_v46  ;;  %v1283_v11 = vmul.f32 0.5, %v2972_v10 }
 0x421   :  { %v1286_v49 = vmul.f32 %v2970_v47, %v1280_v45  ;;  %v1297_v45 = vunpack.c.l.bf16 %v1294_v17 }
 0x422   :  { %v1285_v50 = vmul.f32 %v1282_v48, %v3401_v33  ;;  %v1284_v12 = vadd.f32 0.5, %v1283_v11  ;;  %v1293_v33 = vld [vmem:[#allocation4 + $0x40] sm:$0xff] }
 0x423   :  { %v1295_v16 = vunpack.c.l.bf16 %v1293_v33  ;;  %v1296_v18 = vunpack.c.h.bf16 %v1293_v33 }
 0x424   :  { %v3505_v9 = vadd.f32 %v1286_v49, %v1285_v50 }
 0x426   :  { %2973 = vtanh.f32 %v3505_v9 }
 0x430   :  { %v2974_v13 = vpop.eup %2973 }
 0x431   :  { %v1289_v14 = vmul.f32 %v2974_v13, %v1284_v12 }
 0x433   :  { %1291 = vst [vmem:[#allocation9 + $0x18] sm:$0xff] %v1289_v14  ;;  %v1299_v15 = vpack.c.bf16 %v1289_v14, %v1289_v14 }
 0x435   :  { %1525 = vmatmul.mubr.bf16.vlgmr.msra.gmra.mrb[16].mxu0 %v1299_v15  ;;  %1566 = vmatmul.mubr.bf16.vlgmr.msra.gmra.mrb[16].mxu1 %v1299_v15 }
 0x436   :  { %1800 = vmatpush1.bf16.msra.mxu0 %v3410_v53  ;;  %1841 = vmatpush1.bf16.msra.mxu1 %v3412_v54 }
 0x437   :  { %1801 = vmatprep.subr.bf16.mxu0 %v3418_v55  ;;  %1842 = vmatprep.subr.bf16.mxu1 %v3420_v56 }
 0x438   :  { %1831 = vmatprep.mubr.bf16.mxu0 %v3137_v0  ;;  %1872 = vmatprep.mubr.bf16.mxu1 %v3137_v0 }
 0x43a   :  { %1802 = vmatpush1.bf16.msra.mxu0 %v3422_v1  ;;  %1843 = vmatpush1.bf16.msra.mxu1 %v3424_v3 }
 0x43b   :  { %1803 = vmatprep.subr.bf16.mxu0 %v3430_v57  ;;  %1844 = vmatprep.subr.bf16.mxu1 %v3432_v58 }
 0x43e   :  { %1804 = vmatpush1.bf16.msra.mxu0 %v3434_v59  ;;  %1845 = vmatpush1.bf16.msra.mxu1 %v3436_v60 }
 0x43f   :  { %1805 = vmatprep.subr.bf16.mxu0 %v3442_v61  ;;  %1846 = vmatprep.subr.bf16.mxu1 %v3444_v62 }
 0x442   :  { %1806 = vmatpush1.bf16.msra.mxu0 %v3446_v63  ;;  %1847 = vmatpush1.bf16.msra.mxu1 %v3448_v34 }
 0x443   :  { %1807 = vmatprep.subr.bf16.mxu0 %v3454_v35  ;;  %1848 = vmatprep.subr.bf16.mxu1 %v3456_v36 }
 0x446   :  { %1808 = vmatpush1.bf16.msra.mxu0 %v3458_v37  ;;  %1849 = vmatpush1.bf16.msra.mxu1 %v3460_v38 }
 0x447   :  { %1809 = vmatprep.subr.bf16.mxu0 %v3468_v40  ;;  %1850 = vmatprep.subr.bf16.mxu1 %v3472_v42 }
 0x44a   :  { %1810 = vmatpush1.bf16.msra.mxu0 %v3466_v39  ;;  %1851 = vmatpush1.bf16.msra.mxu1 %v3470_v41 }
 0x44b   :  { %1811 = vmatprep.subr.bf16.mxu0 %v3474_v43  ;;  %1852 = vmatprep.subr.bf16.mxu1 %v3477_v44 }
 0x44e   :  { %1812 = vmatpush1.bf16.msra.mxu0 %v3482_v2  ;;  %1853 = vmatpush1.bf16.msra.mxu1 %v3484_v4 }
 0x44f   :  { %1813 = vmatprep.subr.bf16.mxu0 %v3488_v5  ;;  %1854 = vmatprep.subr.bf16.mxu1 %v3490_v6 }
 0x452   :  { %1814 = vmatpush1.bf16.msra.mxu0 %v3494_v7  ;;  %1855 = vmatpush1.bf16.msra.mxu1 %v3496_v8 }
 0x453   :  { %2106 = vmatprep.subr.bf16.mxu0 %v3406_v51  ;;  %2147 = vmatprep.subr.bf16.mxu1 %v3408_v52 }
 0x508   :  { %v1526_v19 = vpop.f32.mrb[16].mxu0  ;;  %v1567_v20 = vpop.f32.mrb[16].mxu1 }
 0x509   :  { %v1574_v21 = vadd.f32 %v1526_v19, %v1295_v16  ;;  %v1528_v22 = vpop.f32.mrb[17].mxu0  ;;  %v1569_v24 = vpop.f32.mrb[17].mxu1  ;;  %v1576_v46 = vadd.f32 %v1567_v20, %v1297_v45 }
 0x50a   :  { %v1575_v25 = vadd.f32 %v1528_v22, %v1296_v18  ;;  %v1530_v26 = vpop.f32.mrb[18].mxu0  ;;  %v1571_v27 = vpop.f32.mrb[18].mxu1  ;;  %v1577_v32 = vadd.f32 %v1569_v24, %v1298_v23  ;;  %v1601_v23 = vld [vmem:[#allocation4 + $0x58] sm:$0xff] }
 0x50b   :  { %v1578_v28 = vmul.f32 0.5, %v1574_v21  ;;  %v1531_v29 = vpop.f32.mrb[19].mxu0  ;;  %v1572_v30 = vpop.f32.mrb[19].mxu1  ;;  %v1580_v47 = vmul.f32 0.5, %v1576_v46 }
 0x50c   :  { %v1579_v31 = vmul.f32 0.5, %v1575_v25  ;;  %v1605_v29 = vunpack.c.h.bf16 %v1601_v23 }
 0x50d   :  { %2975 = vtanh.f32 %v1578_v28 }
 0x50e   :  { %2977 = vtanh.f32 %v1579_v31 }
 0x50f   :  { %2979 = vtanh.f32 %v1577_v32 }
 0x510   :  { %2981 = vtanh.f32 %v1580_v47 }
 0x517   :  { %v2976_v48 = vpop.eup %2975 }
 0x518   :  { %v1586_v49 = vmul.f32 0.5, %v2976_v48  ;;  %v2978_v50 = vpop.eup %2977 }
 0x519   :  { %v1588_v11 = vmul.f32 0.5, %v2978_v50  ;;  %v2980_v12 = vpop.eup %2979 }
 0x51a   :  { %v1587_v10 = vadd.f32 0.5, %v1586_v49  ;;  %v2982_v16 = vpop.eup %2981 }
 0x51b   :  { %v1589_v13 = vadd.f32 0.5, %v1588_v11  ;;  %v1590_v17 = vmul.f32 0.5, %v2982_v16 }
 0x51c   :  { %v1593_v14 = vmul.f32 %v2980_v12, %v1587_v10 }
 0x51d   :  { %v1592_v15 = vmul.f32 %v1589_v13, %v3505_v9  ;;  %v1591_v18 = vadd.f32 0.5, %v1590_v17  ;;  %v1600_v9 = vld [vmem:[#allocation4 + $0x50] sm:$0xff] }
 0x51e   :  { %v1602_v22 = vunpack.c.l.bf16 %v1600_v9  ;;  %v1603_v24 = vunpack.c.h.bf16 %v1600_v9 }
 0x51f   :  { %v3543_v33 = vadd.f32 %v1593_v14, %v1592_v15 }
 0x521   :  { %2983 = vtanh.f32 %v3543_v33 }
 0x52b   :  { %v2984_v19 = vpop.eup %2983 }
 0x52c   :  { %v1596_v20 = vmul.f32 %v2984_v19, %v1591_v18 }
 0x52e   :  { %1598 = vst [vmem:[#allocation9 + $0x20] sm:$0xff] %v1596_v20  ;;  %v1606_v21 = vpack.c.bf16 %v1596_v20, %v1596_v20 }
 0x530   :  { %1832 = vmatmul.mubr.bf16.vlgmr.msra.gmra.mrb[20].mxu0 %v1606_v21  ;;  %1873 = vmatmul.mubr.bf16.vlgmr.msra.gmra.mrb[20].mxu1 %v1606_v21 }
 0x531   :  { %2107 = vmatpush1.bf16.msra.mxu0 %v3410_v53  ;;  %2148 = vmatpush1.bf16.msra.mxu1 %v3412_v54 }
 0x532   :  { %2108 = vmatprep.subr.bf16.mxu0 %v3418_v55  ;;  %2149 = vmatprep.subr.bf16.mxu1 %v3420_v56 }
 0x533   :  { %2138 = vmatprep.mubr.bf16.mxu0 %v3137_v0  ;;  %2179 = vmatprep.mubr.bf16.mxu1 %v3137_v0 }
 0x535   :  { %2109 = vmatpush1.bf16.msra.mxu0 %v3422_v1  ;;  %2150 = vmatpush1.bf16.msra.mxu1 %v3424_v3 }
 0x536   :  { %2110 = vmatprep.subr.bf16.mxu0 %v3430_v57  ;;  %2151 = vmatprep.subr.bf16.mxu1 %v3432_v58 }
 0x539   :  { %2111 = vmatpush1.bf16.msra.mxu0 %v3434_v59  ;;  %2152 = vmatpush1.bf16.msra.mxu1 %v3436_v60 }
 0x53a   :  { %2112 = vmatprep.subr.bf16.mxu0 %v3442_v61  ;;  %2153 = vmatprep.subr.bf16.mxu1 %v3444_v62 }
 0x53d   :  { %2113 = vmatpush1.bf16.msra.mxu0 %v3446_v63  ;;  %2154 = vmatpush1.bf16.msra.mxu1 %v3448_v34 }
 0x53e   :  { %2114 = vmatprep.subr.bf16.mxu0 %v3454_v35  ;;  %2155 = vmatprep.subr.bf16.mxu1 %v3456_v36 }
 0x541   :  { %2115 = vmatpush1.bf16.msra.mxu0 %v3458_v37  ;;  %2156 = vmatpush1.bf16.msra.mxu1 %v3460_v38 }
 0x542   :  { %2116 = vmatprep.subr.bf16.mxu0 %v3468_v40  ;;  %2157 = vmatprep.subr.bf16.mxu1 %v3472_v42 }
 0x545   :  { %2117 = vmatpush1.bf16.msra.mxu0 %v3466_v39  ;;  %2158 = vmatpush1.bf16.msra.mxu1 %v3470_v41 }
 0x546   :  { %2118 = vmatprep.subr.bf16.mxu0 %v3474_v43  ;;  %2159 = vmatprep.subr.bf16.mxu1 %v3477_v44 }
 0x549   :  { %2119 = vmatpush1.bf16.msra.mxu0 %v3482_v2  ;;  %2160 = vmatpush1.bf16.msra.mxu1 %v3484_v4 }
 0x54a   :  { %2120 = vmatprep.subr.bf16.mxu0 %v3488_v5  ;;  %2161 = vmatprep.subr.bf16.mxu1 %v3490_v6 }
 0x54d   :  { %2121 = vmatpush1.bf16.msra.mxu0 %v3494_v7  ;;  %2162 = vmatpush1.bf16.msra.mxu1 %v3496_v8 }
 0x54e   :  { %2413 = vmatprep.subr.bf16.mxu0 %v3406_v51  ;;  %2454 = vmatprep.subr.bf16.mxu1 %v3408_v52  ;;  %v1604_v52 = vunpack.c.l.bf16 %v1601_v23 }
 0x603   :  { %v1833_v25 = vpop.f32.mrb[20].mxu0  ;;  %v1874_v26 = vpop.f32.mrb[20].mxu1 }
 0x604   :  { %v1881_v27 = vadd.f32 %v1833_v25, %v1602_v22  ;;  %v1835_v28 = vpop.f32.mrb[21].mxu0  ;;  %v1876_v30 = vpop.f32.mrb[21].mxu1  ;;  %v1883_v50 = vadd.f32 %v1874_v26, %v1604_v52 }
 0x605   :  { %v1882_v31 = vadd.f32 %v1835_v28, %v1603_v24  ;;  %v1837_v32 = vpop.f32.mrb[22].mxu0  ;;  %v1878_v45 = vpop.f32.mrb[22].mxu1  ;;  %v1884_v51 = vadd.f32 %v1876_v30, %v1605_v29 }
 0x606   :  { %v1885_v46 = vmul.f32 0.5, %v1881_v27  ;;  %v1838_v47 = vpop.f32.mrb[23].mxu0  ;;  %v1879_v48 = vpop.f32.mrb[23].mxu1  ;;  %v1887_v10 = vmul.f32 0.5, %v1883_v50  ;;  %v2215_v45 = vld [vmem:[#allocation4 + $0x78] sm:$0xff] }
 0x607   :  { %v1886_v49 = vmul.f32 0.5, %v1882_v31  ;;  %v2214_v31 = vld [vmem:[#allocation4 + $0x70] sm:$0xff]  ;;  %v2219_v52 = vunpack.c.h.bf16 %v2215_v45 }
 0x608   :  { %2985 = vtanh.f32 %v1885_v46  ;;  %v2216_v32 = vunpack.c.l.bf16 %v2214_v31  ;;  %v2217_v46 = vunpack.c.h.bf16 %v2214_v31 }
 0x609   :  { %2987 = vtanh.f32 %v1886_v49 }
 0x60a   :  { %2989 = vtanh.f32 %v1884_v51 }
 0x60b   :  { %2991 = vtanh.f32 %v1887_v10 }
 0x612   :  { %v2986_v11 = vpop.eup %2985 }
 0x613   :  { %v1893_v12 = vmul.f32 0.5, %v2986_v11  ;;  %v2988_v13 = vpop.eup %2987 }
 0x614   :  { %v1895_v15 = vmul.f32 0.5, %v2988_v13  ;;  %v2990_v16 = vpop.eup %2989 }
 0x615   :  { %v1894_v14 = vadd.f32 0.5, %v1893_v12  ;;  %v2992_v21 = vpop.eup %2991 }
 0x616   :  { %v1896_v17 = vadd.f32 0.5, %v1895_v15  ;;  %v1897_v9 = vmul.f32 0.5, %v2992_v21 }
 0x617   :  { %v1900_v18 = vmul.f32 %v2990_v16, %v1894_v14 }
 0x618   :  { %v1899_v19 = vmul.f32 %v1896_v17, %v3543_v33  ;;  %v1898_v22 = vadd.f32 0.5, %v1897_v9 }
 0x61a   :  { %v3581_v20 = vadd.f32 %v1900_v18, %v1899_v19  ;;  %v2218_v18 = vunpack.c.l.bf16 %v2215_v45 }
 0x61c   :  { %2993 = vtanh.f32 %v3581_v20 }
 0x626   :  { %v2994_v23 = vpop.eup %2993 }
 0x627   :  { %v1903_v24 = vmul.f32 %v2994_v23, %v1898_v22 }
 0x629   :  { %1905 = vst [vmem:[#allocation9 + $0x28] sm:$0xff] %v1903_v24  ;;  %v1913_v25 = vpack.c.bf16 %v1903_v24, %v1903_v24 }
 0x62b   :  { %2139 = vmatmul.mubr.bf16.vlgmr.msra.gmra.mrb[24].mxu0 %v1913_v25  ;;  %2180 = vmatmul.mubr.bf16.vlgmr.msra.gmra.mrb[24].mxu1 %v1913_v25 }
 0x62c   :  { %2414 = vmatpush1.bf16.msra.mxu0 %v3410_v53  ;;  %2455 = vmatpush1.bf16.msra.mxu1 %v3412_v54  ;;  %v1908_v54 = vld [vmem:[#allocation4 + $0x68] sm:$0xff] }
 0x62d   :  { %2415 = vmatprep.subr.bf16.mxu0 %v3418_v55  ;;  %2456 = vmatprep.subr.bf16.mxu1 %v3420_v56 }
 0x62e   :  { %2445 = vmatprep.mubr.bf16.mxu0 %v3137_v0  ;;  %2486 = vmatprep.mubr.bf16.mxu1 %v3137_v0  ;;  %v1907_v0 = vld [vmem:[#allocation4 + $0x60] sm:$0xff] }
 0x62f   :  { %v1909_v53 = vunpack.c.l.bf16 %v1907_v0  ;;  %v1910_v55 = vunpack.c.h.bf16 %v1907_v0 }
 0x630   :  { %2416 = vmatpush1.bf16.msra.mxu0 %v3422_v1  ;;  %2457 = vmatpush1.bf16.msra.mxu1 %v3424_v3 }
 0x631   :  { %2417 = vmatprep.subr.bf16.mxu0 %v3430_v57  ;;  %2458 = vmatprep.subr.bf16.mxu1 %v3432_v58  ;;  %v1912_v58 = vunpack.c.h.bf16 %v1908_v54 }
 0x634   :  { %2418 = vmatpush1.bf16.msra.mxu0 %v3434_v59  ;;  %2459 = vmatpush1.bf16.msra.mxu1 %v3436_v60 }
 0x635   :  { %2419 = vmatprep.subr.bf16.mxu0 %v3442_v61  ;;  %2460 = vmatprep.subr.bf16.mxu1 %v3444_v62 }
 0x638   :  { %2420 = vmatpush1.bf16.msra.mxu0 %v3446_v63  ;;  %2461 = vmatpush1.bf16.msra.mxu1 %v3448_v34 }
 0x639   :  { %2421 = vmatprep.subr.bf16.mxu0 %v3454_v35  ;;  %2462 = vmatprep.subr.bf16.mxu1 %v3456_v36 }
 0x63c   :  { %2422 = vmatpush1.bf16.msra.mxu0 %v3458_v37  ;;  %2463 = vmatpush1.bf16.msra.mxu1 %v3460_v38  ;;  %v1911_v38 = vunpack.c.l.bf16 %v1908_v54 }
 0x63d   :  { %2423 = vmatprep.subr.bf16.mxu0 %v3468_v40  ;;  %2464 = vmatprep.subr.bf16.mxu1 %v3472_v42 }
 0x640   :  { %2424 = vmatpush1.bf16.msra.mxu0 %v3466_v39  ;;  %2465 = vmatpush1.bf16.msra.mxu1 %v3470_v41 }
 0x641   :  { %2425 = vmatprep.subr.bf16.mxu0 %v3474_v43  ;;  %2466 = vmatprep.subr.bf16.mxu1 %v3477_v44 }
 0x644   :  { %2426 = vmatpush1.bf16.msra.mxu0 %v3482_v2  ;;  %2467 = vmatpush1.bf16.msra.mxu1 %v3484_v4 }
 0x645   :  { %2427 = vmatprep.subr.bf16.mxu0 %v3488_v5  ;;  %2468 = vmatprep.subr.bf16.mxu1 %v3490_v6 }
 0x648   :  { %2428 = vmatpush1.bf16.msra.mxu0 %v3494_v7  ;;  %2469 = vmatpush1.bf16.msra.mxu1 %v3496_v8 }
 0x6fe   :  { %v2140_v56 = vpop.f32.mrb[24].mxu0  ;;  %v2181_v1 = vpop.f32.mrb[24].mxu1 }
 0x6ff   :  { %v2188_v3 = vadd.f32 %v2140_v56, %v1909_v53  ;;  %v2142_v57 = vpop.f32.mrb[25].mxu0  ;;  %v2183_v59 = vpop.f32.mrb[25].mxu1  ;;  %v2190_v39 = vadd.f32 %v2181_v1, %v1911_v38 }
 0x700   :  { %v2189_v60 = vadd.f32 %v2142_v57, %v1910_v55  ;;  %v2144_v61 = vpop.f32.mrb[26].mxu0  ;;  %v2185_v62 = vpop.f32.mrb[26].mxu1  ;;  %v2191_v37 = vadd.f32 %v2183_v59, %v1912_v58 }
 0x701   :  { %v2192_v63 = vmul.f32 0.5, %v2188_v3  ;;  %v2145_v34 = vpop.f32.mrb[27].mxu0  ;;  %v2186_v35 = vpop.f32.mrb[27].mxu1  ;;  %v2194_v40 = vmul.f32 0.5, %v2190_v39 }
 0x702   :  { %v2193_v36 = vmul.f32 0.5, %v2189_v60 }
 0x703   :  { %2995 = vtanh.f32 %v2192_v63 }
 0x704   :  { %2997 = vtanh.f32 %v2193_v36 }
 0x705   :  { %2999 = vtanh.f32 %v2191_v37 }
 0x706   :  { %3001 = vtanh.f32 %v2194_v40 }
 0x70d   :  { %v2996_v41 = vpop.eup %2995 }
 0x70e   :  { %v2200_v42 = vmul.f32 0.5, %v2996_v41  ;;  %v2998_v43 = vpop.eup %2997 }
 0x70f   :  { %v2202_v2 = vmul.f32 0.5, %v2998_v43  ;;  %v3000_v4 = vpop.eup %2999 }
 0x710   :  { %v2201_v44 = vadd.f32 0.5, %v2200_v42  ;;  %v3002_v33 = vpop.eup %3001 }
 0x711   :  { %v2203_v5 = vadd.f32 0.5, %v2202_v2  ;;  %v2204_v26 = vmul.f32 0.5, %v3002_v33 }
 0x712   :  { %v2207_v6 = vmul.f32 %v3000_v4, %v2201_v44 }
 0x713   :  { %v2206_v7 = vmul.f32 %v2203_v5, %v3581_v20  ;;  %v2205_v27 = vadd.f32 0.5, %v2204_v26 }
 0x715   :  { %v2208_v8 = vadd.f32 %v2207_v6, %v2206_v7 }
 0x717   :  { %3003 = vtanh.f32 %v2208_v8 }
 0x721   :  { %v3004_v28 = vpop.eup %3003 }
 0x722   :  { %v2210_v29 = vmul.f32 %v3004_v28, %v2205_v27 }
 0x724   :  { %2212 = vst [vmem:[#allocation9 + $0x30] sm:$0xff] %v2210_v29  ;;  %v2220_v30 = vpack.c.bf16 %v2210_v29, %v2210_v29 }
 0x726   :  { %2446 = vmatmul.mubr.bf16.vlgmr.msra.gmra.mrb[28].mxu0 %v2220_v30  ;;  %2487 = vmatmul.mubr.bf16.vlgmr.msra.gmra.mrb[28].mxu1 %v2220_v30 }
 0x7f9   :  { %v2447_v47 = vpop.f32.mrb[28].mxu0  ;;  %v2488_v48 = vpop.f32.mrb[28].mxu1 }
 0x7fa   :  { %v2495_v49 = vadd.f32 %v2447_v47, %v2216_v32  ;;  %v2449_v51 = vpop.f32.mrb[29].mxu0  ;;  %v2490_v50 = vpop.f32.mrb[29].mxu1  ;;  %v2497_v19 = vadd.f32 %v2488_v48, %v2218_v18 }
 0x7fb   :  { %v2496_v10 = vadd.f32 %v2449_v51, %v2217_v46  ;;  %v2451_v11 = vpop.f32.mrb[30].mxu0  ;;  %v2492_v12 = vpop.f32.mrb[30].mxu1  ;;  %v2498_v17 = vadd.f32 %v2490_v50, %v2219_v52 }
 0x7fc   :  { %v2499_v13 = vmul.f32 0.5, %v2495_v49  ;;  %v2452_v14 = vpop.f32.mrb[31].mxu0  ;;  %v2493_v15 = vpop.f32.mrb[31].mxu1  ;;  %v2501_v20 = vmul.f32 0.5, %v2497_v19 }
 0x7fd   :  { %v2500_v16 = vmul.f32 0.5, %v2496_v10 }
 0x7fe   :  { %3005 = vtanh.f32 %v2499_v13 }
 0x7ff   :  { %3007 = vtanh.f32 %v2500_v16 }
 0x800   :  { %3009 = vtanh.f32 %v2498_v17 }
 0x801   :  { %3011 = vtanh.f32 %v2501_v20 }
 0x808   :  { %v3006_v21 = vpop.eup %3005 }
 0x809   :  { %v2507_v9 = vmul.f32 0.5, %v3006_v21  ;;  %v3008_v22 = vpop.eup %3007 }
 0x80a   :  { %v2509_v24 = vmul.f32 0.5, %v3008_v22  ;;  %v3010_v25 = vpop.eup %3009 }
 0x80b   :  { %v2508_v23 = vadd.f32 0.5, %v2507_v9  ;;  %v3012_v56 = vpop.eup %3011 }
 0x80c   :  { %v2510_v0 = vadd.f32 0.5, %v2509_v24  ;;  %v2511_v1 = vmul.f32 0.5, %v3012_v56 }
 0x80d   :  { %v2514_v53 = vmul.f32 %v3010_v25, %v2508_v23 }
 0x80e   :  { %v2513_v54 = vmul.f32 %v2510_v0, %v2208_v8  ;;  %v2512_v3 = vadd.f32 0.5, %v2511_v1 }
 0x810   :  { %v2515_v55 = vadd.f32 %v2514_v53, %v2513_v54 }
 0x812   :  { %2526 = vst [vmem:[#allocation12] sm:$0xff] %v2515_v55  ;;  %3013 = vtanh.f32 %v2515_v55 }
 0x81c   :  { %v3014_v57 = vpop.eup %3013 }
 0x81d   :  { %v2517_v58 = vmul.f32 %v3014_v57, %v2512_v3 }
 0x81f   :  { %2519 = vst [vmem:[#allocation9 + $0x38] sm:$0xff] %v2517_v58  ;;  %2525 = vst [vmem:[#allocation10] sm:$0xff] %v2517_v58 }
 0x820   :  { %3070 = shalt.err (!%p3067_p6)
}
 0x821   :  { %s3071_s22 = scalar_lea.hbm %s3670_s3, 128 }
 0x822   :  { %p3072_p7 = scmp.ne.s32.totalorder %s3670_s3, %s3071_s22  ;;  %p3075_p8 = scmp.lt.u32.totalorder %s3071_s22, %s3670_s3 }
 0x824   :  { %p3077_p9 = pnand %p3075_p8, %p3072_p7 }
 0x826   :  { %3080 = shalt.err (!%p3077_p9)
}
 0x827   :  { %2548 = dma.vmem_to_hbm [thread:$0]  %s2546_s14, 128, %s3670_s3, [#allocation11]  }
 0x828   :  { %s3081_s29 = scalar_lea.vmem %s3617_s16, 1024  ;;  %p3086_p11 = scmp.lt.s32.totalorder %s3617_s16, %s3617_s16 }
 0x829   :  { %p3082_p10 = scmp.ne.s32.totalorder %s3617_s16, %s3081_s29  ;;  %p3087_p12 = scmp.lt.s32.totalorder %s3081_s29, %s3081_s29 }
 0x82b   :  { %p3088_p13 = por %p3087_p12, %p3086_p11 }
 0x82d   :  { %p3089_p0 = pnand %p3088_p13, %p3082_p10 }
 0x82f   :  { %3092 = shalt.err (!%p3089_p0)
}
 0x830   :  { %s3093_s6 = scalar_lea.hbm %s3669_s2, 1024 }
 0x831   :  { %p3094_p1 = scmp.ne.s32.totalorder %s3669_s2, %s3093_s6  ;;  %p3097_p2 = scmp.lt.u32.totalorder %s3093_s6, %s3669_s2 }
 0x833   :  { %p3099_p3 = pnand %p3097_p2, %p3094_p1 }
 0x835   :  { %3102 = shalt.err (!%p3099_p3)
}
 0x836   :  { %s3142_s3 = smov 128   ;;  %s3143_s11 = smov 8  }
 0x837   :  { %2538 = dma.vmem_to_hbm [thread:$0]  %s3617_s16, 1024, %s3669_s2, [#allocation6], %s3142_s3, %s3142_s3, %s3143_s11  }
 0x838   :  { %s3103_s13 = scalar_lea.vmem %s3619_s18, 128  ;;  %p3108_p5 = scmp.lt.s32.totalorder %s3619_s18, %s3619_s18 }
 0x839   :  { %p3104_p4 = scmp.ne.s32.totalorder %s3619_s18, %s3103_s13  ;;  %p3109_p6 = scmp.lt.s32.totalorder %s3103_s13, %s3103_s13 }
 0x83b   :  { %p3110_p7 = por %p3109_p6, %p3108_p5 }
 0x83d   :  { %p3111_p8 = pnand %p3110_p7, %p3104_p4 }
 0x83f   :  { %3114 = shalt.err (!%p3111_p8)
}
 0x840   :  { %s3115_s15 = scalar_lea.hbm %s3671_s4, 128 }
 0x841   :  { %p3116_p9 = scmp.ne.s32.totalorder %s3671_s4, %s3115_s15  ;;  %p3119_p10 = scmp.lt.u32.totalorder %s3115_s15, %s3671_s4 }
 0x843   :  { %p3121_p11 = pnand %p3119_p10, %p3116_p9 }
 0x845   :  { %3124 = shalt.err (!%p3121_p11)
}
 0x846   :  { %2558 = dma.vmem_to_hbm [thread:$0]  %s3619_s18, 128, %s3671_s4, [#allocation11]  }
 0x847   :  { %3129 = dma.done.wait [#allocation6], 1024  }
 0x848   :  { %3130 = vsyncadd [#allocation6], 4294966272 }
 0x849   :  { %3131 = dma.done.wait [#allocation11], 256  }
 0x84a   :  { %3132 = vsyncadd [#allocation11], 4294967040 }
 0x84b   :  { %2568 = vsyncpa [#allocation5], 1 }
 0x84c   :  { %2569 = vsyncpa [#allocation8], 1 }
 0x84d   :  { %2570 = vsyncpa [#allocation6], 1 }
 0x84e   :  { %2571 = vsyncpa [#allocation11], 1 }

</bundles_post_ra>
